<compile_context>
chip_gen: v7x
topology: tpu7x:2x2x1
jax: 0.10.0
libtpu: 0.0.40
codegen_flags: <defaults>
</compile_context>

<pallas_src>
import jax
import jax.numpy as jnp
from jax.experimental import pallas as pl
from jax.experimental.pallas import tpu as pltpu

# ----------------------------- model hyper-params -----------------------------
MAX_LEN = 32          # >= 27 so last_conv_size >= 1
LATENT_DIM = 8
VOCAB_SIZE = 20
EMB_DIM = 16
BATCH = 2

K1, K2, K3 = 9, 9, 11
C1, C2, C3 = 9, 9, 10
L1 = MAX_LEN - K1 + 1          # 24
L2 = L1 - K2 + 1               # 16
L3 = L2 - K3 + 1               # 6  == last_conv_size
FLAT = L3 * C3                 # 60
HID = 435


# --------------------------------- the kernel ---------------------------------
def encoder_kernel(tok_ref,                       # (B*L, 1) int32
                   table_ref,                     # (VOCAB, EMB)   bf16
                   c1w_ref, c1b_ref,              # (K1, EMB, C1) bf16, (1, C1) f32
                   c2w_ref, c2b_ref,              # (K2, C1, C2)  bf16, (1, C2) f32
                   c3w_ref, c3b_ref,              # (K3, C2, C3)  bf16, (1, C3) f32
                   w1_ref, b1_ref,                # (L3, C3, HID) bf16, (1, HID) f32
                   wh_ref, bh_ref,                # (HID, 2*LAT)  bf16, (1, 2*LAT) f32
                   out_ref):                      # (B, 2*LAT) f32
    f32, bf16 = jnp.float32, jnp.bfloat16
    bl = tok_ref.shape[0]                         # B * MAX_LEN (batch folded in)
    nb = bl // MAX_LEN

    # ---- embedding lookup as a one-hot MXU matmul (no serial scalar gather) ----
    tok = tok_ref[...]                                                 # (B*L, 1) int32
    vocab_ids = jax.lax.broadcasted_iota(jnp.int32, (bl, VOCAB_SIZE), 1)
    onehot = (tok == vocab_ids).astype(bf16)                           # (B*L, VOCAB)
    emb = jnp.dot(onehot, table_ref[...],
                  preferred_element_type=f32).astype(bf16)             # (B*L, EMB)

    # Per-tap "conv" over the flat (B*L, C) buffer.  Rows that straddle a sample
    # boundary are garbage but are never read by any downstream valid row.
    def conv_taps(x, w_ref, b_ref, ksize, rout):
        acc = jnp.dot(x[0:rout, :], w_ref[0], preferred_element_type=f32)
        for k in range(1, ksize):
            acc = acc + jnp.dot(x[k:k + rout, :], w_ref[k],
                                preferred_element_type=f32)
        # bias + ReLU stay f32 (VPU); one bf16 cast per layer output for the MXU.
        return jnp.maximum(acc + b_ref[...], 0.0).astype(bf16)

    r1 = bl - K1 + 1                                                   # 56
    r2 = r1 - K2 + 1                                                   # 48
    r3 = r2 - K3 + 1                                                   # 38
    h1 = conv_taps(emb, c1w_ref, c1b_ref, K1, r1)                      # (r1, C1)
    h2 = conv_taps(h1,  c2w_ref, c2b_ref, K2, r2)                      # (r2, C2)
    h3 = conv_taps(h2,  c3w_ref, c3b_ref, K3, r3)                      # (r3, C3)

    # Compact the valid conv3 rows: sample b lives at rows [b*MAX_LEN, b*MAX_LEN+L3).
    h3c = jnp.concatenate(
        [h3[b * MAX_LEN:b * MAX_LEN + L3, :] for b in range(nb)], axis=0)   # (B*L3, C3)

    # Linear w1 == per-tap conv with kernel length L3 over the compacted buffer;
    # sample b's hidden vector ends up at row b*L3.
    rl = (nb - 1) * L3 + 1
    h = conv_taps(h3c, w1_ref, b1_ref, L3, rl)                         # (rl, HID)

    hb = jnp.concatenate([h[b * L3:b * L3 + 1, :] for b in range(nb)], axis=0)  # (B, HID)

    # Fused mean / log_var head: one matmul, one dense store.
    out_ref[...] = (jnp.dot(hb, wh_ref[...], preferred_element_type=f32)
                    + bh_ref[...])


# ---------------------- one-time parameter packing (not in hot path) -----------
def pack_params(params):
    bf16 = jnp.bfloat16

    def conv_pack(w):   # PyTorch (O, Cin, K) -> per-tap (K, Cin, O)
        return jnp.transpose(w, (2, 1, 0)).astype(bf16)

    # w1 flat index in PyTorch is c*L3 + t (channel-major flatten of (C3, L3)).
    w1r = params["w1"].reshape(HID, C3, L3)                  # [o, c, t]
    w1p = jnp.transpose(w1r, (2, 1, 0)).astype(bf16)         # (L3, C3, HID) = [t, c, o]

    return {
        "table": params["embedding"].astype(bf16),
        "c1w": conv_pack(params["c1w"]), "c1b": params["c1b"].reshape(1, -1),
        "c2w": conv_pack(params["c2w"]), "c2b": params["c2b"].reshape(1, -1),
        "c3w": conv_pack(params["c3w"]), "c3b": params["c3b"].reshape(1, -1),
        "w1": w1p,                       "b1": params["b1"].reshape(1, -1),
        "wh": jnp.concatenate([params["wm"].T, params["wv"].T], axis=1).astype(bf16),
        "bh": jnp.concatenate([params["bm"], params["bv"]]).reshape(1, -1),
    }


# ------------------------------- python wrapper --------------------------------
@jax.jit
def cnn_encoder_forward(tokens, packed):
    b = tokens.shape[0]
    tok2d = tokens.reshape(b * MAX_LEN, 1).astype(jnp.int32)   # sample-major rows
    args = (tok2d, packed["table"],
            packed["c1w"], packed["c1b"], packed["c2w"], packed["c2b"],
            packed["c3w"], packed["c3b"], packed["w1"], packed["b1"],
            packed["wh"], packed["bh"])

    def full_spec(a):   # whole array resident in VMEM, single block
        return pl.BlockSpec(a.shape, lambda i, nd=a.ndim: (0,) * nd)

    heads = pl.pallas_call(
        encoder_kernel,
        out_shape=jax.ShapeDtypeStruct((b, 2 * LATENT_DIM), jnp.float32),
        grid=(1,),                                   # whole batch in one grid step
        in_specs=[full_spec(a) for a in args],
        out_specs=pl.BlockSpec((b, 2 * LATENT_DIM), lambda i: (0, 0)),
        compiler_params=pltpu.CompilerParams(dimension_semantics=("arbitrary",)),
    )(*args)
    return heads[:, :LATENT_DIM], heads[:, LATENT_DIM:]


# ------------------------------ pure-JAX references -----------------------------
def reference_forward_f32(tokens, params):
    """Faithful f32 (PyTorch semantics), HIGHEST matmul precision."""
    hp = jax.lax.Precision.HIGHEST
    emb = jnp.take(params["embedding"], tokens, axis=0)       # (B, L, E)
    x = jnp.transpose(emb, (0, 2, 1))                         # (B, E, L)

    def conv(x, w, b):
        y = jax.lax.conv_general_dilated(x, w, (1,), "VALID",
                                         dimension_numbers=("NCH", "OIH", "NCH"),
                                         precision=hp)
        return y + b[None, :, None]

    h1 = jax.nn.relu(conv(x, params["c1w"], params["c1b"]))
    h2 = jax.nn.relu(conv(h1, params["c2w"], params["c2b"]))
    h3 = jax.nn.relu(conv(h2, params["c3w"], params["c3b"]))
    flat = h3.reshape(x.shape[0], -1)                         # channel-major flatten
    h = jax.nn.relu(jnp.dot(flat, params["w1"].T, precision=hp) + params["b1"])
    zm = jnp.dot(h, params["wm"].T, precision=hp) + params["bm"]
    zv = jnp.dot(h, params["wv"].T, precision=hp) + params["bv"]
    return zm, zv


def reference_forward_bf16(tokens, params):
    """Mirrors kernel numerics: bf16 matmul operands, f32 accumulation / elementwise."""
    bf16, f32 = jnp.bfloat16, jnp.float32
    hp = jax.lax.Precision.HIGHEST
    emb = jnp.take(params["embedding"], tokens, axis=0)
    x = jnp.transpose(emb, (0, 2, 1))

    def conv(x, w, b):
        y = jax.lax.conv_general_dilated(x.astype(bf16), w.astype(bf16), (1,), "VALID",
                                         dimension_numbers=("NCH", "OIH", "NCH"),
                                         preferred_element_type=f32, precision=hp)
        return y + b[None, :, None]

    def mm(a, w):
        return jnp.dot(a.astype(bf16), w.astype(bf16).T,
                       preferred_element_type=f32, precision=hp)

    h1 = jax.nn.relu(conv(x, params["c1w"], params["c1b"]))
    h2 = jax.nn.relu(conv(h1, params["c2w"], params["c2b"]))
    h3 = jax.nn.relu(conv(h2, params["c3w"], params["c3b"]))
    flat = h3.reshape(x.shape[0], -1)
    h = jax.nn.relu(mm(flat, params["w1"]) + params["b1"])
    zm = mm(h, params["wm"]) + params["bm"]
    zv = mm(h, params["wv"]) + params["bv"]
    return zm, zv


# ------------------------------------ main --------------------------------------
def make_params(key):
    ks = jax.random.split(key, 13)
    n = lambda k, shape, s=0.1: (s * jax.random.normal(k, shape)).astype(jnp.float32)
    return {
        "embedding": n(ks[0], (VOCAB_SIZE, EMB_DIM)),
        "c1w": n(ks[1], (C1, EMB_DIM, K1)), "c1b": n(ks[2], (C1,), 0.05),
        "c2w": n(ks[3], (C2, C1, K2)),      "c2b": n(ks[4], (C2,), 0.05),
        "c3w": n(ks[5], (C3, C2, K3)),      "c3b": n(ks[6], (C3,), 0.05),
        "w1":  n(ks[7], (HID, FLAT)),       "b1":  n(ks[8], (HID,), 0.05),
        "wm":  n(ks[9], (LATENT_DIM, HID)), "bm":  n(ks[10], (LATENT_DIM,), 0.05),
        "wv":  n(ks[11], (LATENT_DIM, HID)),"bv":  n(ks[12], (LATENT_DIM,), 0.05),
    }


if __name__ == "__main__":
    key = jax.random.PRNGKey(0)
    k_tok, k_par = jax.random.split(key)
    tokens = jax.random.randint(k_tok, (BATCH, MAX_LEN), 0, VOCAB_SIZE, dtype=jnp.int32)
    params = make_params(k_par)

    packed = pack_params(params)   # one-time repack, outside the jitted forward

    z_mean, z_log_var = cnn_encoder_forward(tokens, packed)
    jax.block_until_ready((z_mean, z_log_var))
    assert z_mean.shape == (BATCH, LATENT_DIM) and z_log_var.shape == (BATCH, LATENT_DIM)

    # strict check vs a reference with identical numerics (bf16 operands, f32 accum)
    zm_b, zv_b = reference_forward_bf16(tokens, params)
    assert jnp.allclose(z_mean, zm_b, rtol=2e-3, atol=2e-3), float(jnp.abs(z_mean - zm_b).max())
    assert jnp.allclose(z_log_var, zv_b, rtol=2e-3, atol=2e-3), float(jnp.abs(z_log_var - zv_b).max())

    # semantic check vs the full-f32 (PyTorch-faithful) reference
    zm_f, zv_f = reference_forward_f32(tokens, params)
    assert jnp.allclose(z_mean, zm_f, rtol=1e-2, atol=1e-2), float(jnp.abs(z_mean - zm_f).max())
    assert jnp.allclose(z_log_var, zv_f, rtol=1e-2, atol=1e-2), float(jnp.abs(z_log_var - zv_f).max())

    print("KERNEL_OK")
</pallas_src>

<mosaic_0001>
module attributes {stable_mosaic.version = 11 : i64} {
  func.func @encoder_kernel(%arg0: i32, %arg1: memref<64x1xi32, #tpu.memory_space<vmem>>, %arg2: memref<20x16xbf16, #tpu.memory_space<vmem>>, %arg3: memref<9x16x9xbf16, #tpu.memory_space<vmem>>, %arg4: memref<1x9xf32, #tpu.memory_space<vmem>>, %arg5: memref<9x9x9xbf16, #tpu.memory_space<vmem>>, %arg6: memref<1x9xf32, #tpu.memory_space<vmem>>, %arg7: memref<11x9x10xbf16, #tpu.memory_space<vmem>>, %arg8: memref<1x10xf32, #tpu.memory_space<vmem>>, %arg9: memref<6x10x435xbf16, #tpu.memory_space<vmem>>, %arg10: memref<1x435xf32, #tpu.memory_space<vmem>>, %arg11: memref<435x16xbf16, #tpu.memory_space<vmem>>, %arg12: memref<1x16xf32, #tpu.memory_space<vmem>>, %arg13: memref<2x16xf32, #tpu.memory_space<vmem>>) attributes {dimension_semantics = [#tpu.dimension_semantics<arbitrary>], iteration_bounds = array<i64: 1>, scalar_prefetch = 0 : i64, scratch_operands = 0 : i64, tpu.core_type = #tpu.core_type<tc>, window_params = [{pipeline_mode = #tpu.pipeline_mode<synchronous>, transform_indices = @transform_0, window_bounds = array<i64: 64, 1>}, {pipeline_mode = #tpu.pipeline_mode<synchronous>, transform_indices = @transform_1, window_bounds = array<i64: 20, 16>}, {pipeline_mode = #tpu.pipeline_mode<synchronous>, transform_indices = @transform_2, window_bounds = array<i64: 9, 16, 9>}, {pipeline_mode = #tpu.pipeline_mode<synchronous>, transform_indices = @transform_3, window_bounds = array<i64: 1, 9>}, {pipeline_mode = #tpu.pipeline_mode<synchronous>, transform_indices = @transform_4, window_bounds = array<i64: 9, 9, 9>}, {pipeline_mode = #tpu.pipeline_mode<synchronous>, transform_indices = @transform_5, window_bounds = array<i64: 1, 9>}, {pipeline_mode = #tpu.pipeline_mode<synchronous>, transform_indices = @transform_6, window_bounds = array<i64: 11, 9, 10>}, {pipeline_mode = #tpu.pipeline_mode<synchronous>, transform_indices = @transform_7, window_bounds = array<i64: 1, 10>}, {pipeline_mode = #tpu.pipeline_mode<synchronous>, transform_indices = @transform_8, window_bounds = array<i64: 6, 10, 435>}, {pipeline_mode = #tpu.pipeline_mode<synchronous>, transform_indices = @transform_9, window_bounds = array<i64: 1, 435>}, {pipeline_mode = #tpu.pipeline_mode<synchronous>, transform_indices = @transform_10, window_bounds = array<i64: 435, 16>}, {pipeline_mode = #tpu.pipeline_mode<synchronous>, transform_indices = @transform_11, window_bounds = array<i64: 1, 16>}, {pipeline_mode = #tpu.pipeline_mode<synchronous>, transform_indices = @transform_12, window_bounds = array<i64: 2, 16>}]} {
    %c0 = arith.constant 0 : index
    %c0_0 = arith.constant 0 : index
    %0 = vector.load %arg1[%c0, %c0_0] : memref<64x1xi32, #tpu.memory_space<vmem>>, vector<64x1xi32>
    %1 = tpu.iota {dimensions = array<i32: 1>} : vector<64x20xi32>
    %2 = vector.broadcast %0 : vector<64x1xi32> to vector<64x20xi32>
    %3 = arith.cmpi eq, %2, %1 : vector<64x20xi32>
    %4 = arith.extui %3 : vector<64x20xi1> to vector<64x20xi32>
    %5 = arith.sitofp %4 : vector<64x20xi32> to vector<64x20xf32>
    %6 = arith.truncf %5 : vector<64x20xf32> to vector<64x20xbf16>
    %c0_1 = arith.constant 0 : index
    %c0_2 = arith.constant 0 : index
    %7 = vector.load %arg2[%c0_1, %c0_2] : memref<20x16xbf16, #tpu.memory_space<vmem>>, vector<20x16xbf16>
    %cst = arith.constant dense<0.000000e+00> : vector<64x16xf32>
    %8 = tpu.matmul %6, %7, %cst {dimension_numbers = #tpu.dot_dimension_numbers<[1], [0], [0], [1], [0, 0, 1, 1], [], []>} : vector<64x20xbf16>, vector<20x16xbf16>, vector<64x16xf32> -> vector<64x16xf32>
    %9 = arith.truncf %8 : vector<64x16xf32> to vector<64x16xbf16>
    %10 = vector.extract_strided_slice %9 {offsets = [0, 0], sizes = [56, 16], strides = [1, 1]} : vector<64x16xbf16> to vector<56x16xbf16>
    %c0_3 = arith.constant 0 : index
    %c0_4 = arith.constant 0 : index
    %c0_5 = arith.constant 0 : index
    %11 = vector.load %arg3[%c0_3, %c0_4, %c0_5] : memref<9x16x9xbf16, #tpu.memory_space<vmem>>, vector<1x16x9xbf16>
    %12 = vector.shape_cast %11 : vector<1x16x9xbf16> to vector<16x9xbf16>
    %cst_6 = arith.constant dense<0.000000e+00> : vector<56x9xf32>
    %13 = tpu.matmul %10, %12, %cst_6 {dimension_numbers = #tpu.dot_dimension_numbers<[1], [0], [0], [1], [0, 0, 1, 1], [], []>} : vector<56x16xbf16>, vector<16x9xbf16>, vector<56x9xf32> -> vector<56x9xf32>
    %14 = vector.extract_strided_slice %9 {offsets = [1, 0], sizes = [56, 16], strides = [1, 1]} : vector<64x16xbf16> to vector<56x16xbf16>
    %c1 = arith.constant 1 : index
    %c0_7 = arith.constant 0 : index
    %c0_8 = arith.constant 0 : index
    %15 = vector.load %arg3[%c1, %c0_7, %c0_8] : memref<9x16x9xbf16, #tpu.memory_space<vmem>>, vector<1x16x9xbf16>
    %16 = vector.shape_cast %15 : vector<1x16x9xbf16> to vector<16x9xbf16>
    %cst_9 = arith.constant dense<0.000000e+00> : vector<56x9xf32>
    %17 = tpu.matmul %14, %16, %cst_9 {dimension_numbers = #tpu.dot_dimension_numbers<[1], [0], [0], [1], [0, 0, 1, 1], [], []>} : vector<56x16xbf16>, vector<16x9xbf16>, vector<56x9xf32> -> vector<56x9xf32>
    %18 = arith.addf %13, %17 : vector<56x9xf32>
    %19 = vector.extract_strided_slice %9 {offsets = [2, 0], sizes = [56, 16], strides = [1, 1]} : vector<64x16xbf16> to vector<56x16xbf16>
    %c2 = arith.constant 2 : index
    %c0_10 = arith.constant 0 : index
    %c0_11 = arith.constant 0 : index
    %20 = vector.load %arg3[%c2, %c0_10, %c0_11] : memref<9x16x9xbf16, #tpu.memory_space<vmem>>, vector<1x16x9xbf16>
    %21 = vector.shape_cast %20 : vector<1x16x9xbf16> to vector<16x9xbf16>
    %cst_12 = arith.constant dense<0.000000e+00> : vector<56x9xf32>
    %22 = tpu.matmul %19, %21, %cst_12 {dimension_numbers = #tpu.dot_dimension_numbers<[1], [0], [0], [1], [0, 0, 1, 1], [], []>} : vector<56x16xbf16>, vector<16x9xbf16>, vector<56x9xf32> -> vector<56x9xf32>
    %23 = arith.addf %18, %22 : vector<56x9xf32>
    %24 = vector.extract_strided_slice %9 {offsets = [3, 0], sizes = [56, 16], strides = [1, 1]} : vector<64x16xbf16> to vector<56x16xbf16>
    %c3 = arith.constant 3 : index
    %c0_13 = arith.constant 0 : index
    %c0_14 = arith.constant 0 : index
    %25 = vector.load %arg3[%c3, %c0_13, %c0_14] : memref<9x16x9xbf16, #tpu.memory_space<vmem>>, vector<1x16x9xbf16>
    %26 = vector.shape_cast %25 : vector<1x16x9xbf16> to vector<16x9xbf16>
    %cst_15 = arith.constant dense<0.000000e+00> : vector<56x9xf32>
    %27 = tpu.matmul %24, %26, %cst_15 {dimension_numbers = #tpu.dot_dimension_numbers<[1], [0], [0], [1], [0, 0, 1, 1], [], []>} : vector<56x16xbf16>, vector<16x9xbf16>, vector<56x9xf32> -> vector<56x9xf32>
    %28 = arith.addf %23, %27 : vector<56x9xf32>
    %29 = vector.extract_strided_slice %9 {offsets = [4, 0], sizes = [56, 16], strides = [1, 1]} : vector<64x16xbf16> to vector<56x16xbf16>
    %c4 = arith.constant 4 : index
    %c0_16 = arith.constant 0 : index
    %c0_17 = arith.constant 0 : index
    %30 = vector.load %arg3[%c4, %c0_16, %c0_17] : memref<9x16x9xbf16, #tpu.memory_space<vmem>>, vector<1x16x9xbf16>
    %31 = vector.shape_cast %30 : vector<1x16x9xbf16> to vector<16x9xbf16>
    %cst_18 = arith.constant dense<0.000000e+00> : vector<56x9xf32>
    %32 = tpu.matmul %29, %31, %cst_18 {dimension_numbers = #tpu.dot_dimension_numbers<[1], [0], [0], [1], [0, 0, 1, 1], [], []>} : vector<56x16xbf16>, vector<16x9xbf16>, vector<56x9xf32> -> vector<56x9xf32>
    %33 = arith.addf %28, %32 : vector<56x9xf32>
    %34 = vector.extract_strided_slice %9 {offsets = [5, 0], sizes = [56, 16], strides = [1, 1]} : vector<64x16xbf16> to vector<56x16xbf16>
    %c5 = arith.constant 5 : index
    %c0_19 = arith.constant 0 : index
    %c0_20 = arith.constant 0 : index
    %35 = vector.load %arg3[%c5, %c0_19, %c0_20] : memref<9x16x9xbf16, #tpu.memory_space<vmem>>, vector<1x16x9xbf16>
    %36 = vector.shape_cast %35 : vector<1x16x9xbf16> to vector<16x9xbf16>
    %cst_21 = arith.constant dense<0.000000e+00> : vector<56x9xf32>
    %37 = tpu.matmul %34, %36, %cst_21 {dimension_numbers = #tpu.dot_dimension_numbers<[1], [0], [0], [1], [0, 0, 1, 1], [], []>} : vector<56x16xbf16>, vector<16x9xbf16>, vector<56x9xf32> -> vector<56x9xf32>
    %38 = arith.addf %33, %37 : vector<56x9xf32>
    %39 = vector.extract_strided_slice %9 {offsets = [6, 0], sizes = [56, 16], strides = [1, 1]} : vector<64x16xbf16> to vector<56x16xbf16>
    %c6 = arith.constant 6 : index
    %c0_22 = arith.constant 0 : index
    %c0_23 = arith.constant 0 : index
    %40 = vector.load %arg3[%c6, %c0_22, %c0_23] : memref<9x16x9xbf16, #tpu.memory_space<vmem>>, vector<1x16x9xbf16>
    %41 = vector.shape_cast %40 : vector<1x16x9xbf16> to vector<16x9xbf16>
    %cst_24 = arith.constant dense<0.000000e+00> : vector<56x9xf32>
    %42 = tpu.matmul %39, %41, %cst_24 {dimension_numbers = #tpu.dot_dimension_numbers<[1], [0], [0], [1], [0, 0, 1, 1], [], []>} : vector<56x16xbf16>, vector<16x9xbf16>, vector<56x9xf32> -> vector<56x9xf32>
    %43 = arith.addf %38, %42 : vector<56x9xf32>
    %44 = vector.extract_strided_slice %9 {offsets = [7, 0], sizes = [56, 16], strides = [1, 1]} : vector<64x16xbf16> to vector<56x16xbf16>
    %c7 = arith.constant 7 : index
    %c0_25 = arith.constant 0 : index
    %c0_26 = arith.constant 0 : index
    %45 = vector.load %arg3[%c7, %c0_25, %c0_26] : memref<9x16x9xbf16, #tpu.memory_space<vmem>>, vector<1x16x9xbf16>
    %46 = vector.shape_cast %45 : vector<1x16x9xbf16> to vector<16x9xbf16>
    %cst_27 = arith.constant dense<0.000000e+00> : vector<56x9xf32>
    %47 = tpu.matmul %44, %46, %cst_27 {dimension_numbers = #tpu.dot_dimension_numbers<[1], [0], [0], [1], [0, 0, 1, 1], [], []>} : vector<56x16xbf16>, vector<16x9xbf16>, vector<56x9xf32> -> vector<56x9xf32>
    %48 = arith.addf %43, %47 : vector<56x9xf32>
    %49 = vector.extract_strided_slice %9 {offsets = [8, 0], sizes = [56, 16], strides = [1, 1]} : vector<64x16xbf16> to vector<56x16xbf16>
    %c8 = arith.constant 8 : index
    %c0_28 = arith.constant 0 : index
    %c0_29 = arith.constant 0 : index
    %50 = vector.load %arg3[%c8, %c0_28, %c0_29] : memref<9x16x9xbf16, #tpu.memory_space<vmem>>, vector<1x16x9xbf16>
    %51 = vector.shape_cast %50 : vector<1x16x9xbf16> to vector<16x9xbf16>
    %cst_30 = arith.constant dense<0.000000e+00> : vector<56x9xf32>
    %52 = tpu.matmul %49, %51, %cst_30 {dimension_numbers = #tpu.dot_dimension_numbers<[1], [0], [0], [1], [0, 0, 1, 1], [], []>} : vector<56x16xbf16>, vector<16x9xbf16>, vector<56x9xf32> -> vector<56x9xf32>
    %53 = arith.addf %48, %52 : vector<56x9xf32>
    %c0_31 = arith.constant 0 : index
    %c0_32 = arith.constant 0 : index
    %54 = vector.load %arg4[%c0_31, %c0_32] : memref<1x9xf32, #tpu.memory_space<vmem>>, vector<1x9xf32>
    %55 = vector.broadcast %54 : vector<1x9xf32> to vector<56x9xf32>
    %56 = arith.addf %53, %55 : vector<56x9xf32>
    %cst_33 = arith.constant 0.000000e+00 : f32
    %57 = vector.broadcast %cst_33 : f32 to vector<56x9xf32>
    %58 = arith.maximumf %56, %57 : vector<56x9xf32>
    %59 = arith.truncf %58 : vector<56x9xf32> to vector<56x9xbf16>
    %60 = vector.extract_strided_slice %59 {offsets = [0, 0], sizes = [48, 9], strides = [1, 1]} : vector<56x9xbf16> to vector<48x9xbf16>
    %c0_34 = arith.constant 0 : index
    %c0_35 = arith.constant 0 : index
    %c0_36 = arith.constant 0 : index
    %61 = vector.load %arg5[%c0_34, %c0_35, %c0_36] : memref<9x9x9xbf16, #tpu.memory_space<vmem>>, vector<1x9x9xbf16>
    %62 = vector.shape_cast %61 : vector<1x9x9xbf16> to vector<9x9xbf16>
    %cst_37 = arith.constant dense<0.000000e+00> : vector<48x9xf32>
    %63 = tpu.matmul %60, %62, %cst_37 {dimension_numbers = #tpu.dot_dimension_numbers<[1], [0], [0], [1], [0, 0, 1, 1], [], []>} : vector<48x9xbf16>, vector<9x9xbf16>, vector<48x9xf32> -> vector<48x9xf32>
    %64 = vector.extract_strided_slice %59 {offsets = [1, 0], sizes = [48, 9], strides = [1, 1]} : vector<56x9xbf16> to vector<48x9xbf16>
    %c1_38 = arith.constant 1 : index
    %c0_39 = arith.constant 0 : index
    %c0_40 = arith.constant 0 : index
    %65 = vector.load %arg5[%c1_38, %c0_39, %c0_40] : memref<9x9x9xbf16, #tpu.memory_space<vmem>>, vector<1x9x9xbf16>
    %66 = vector.shape_cast %65 : vector<1x9x9xbf16> to vector<9x9xbf16>
    %cst_41 = arith.constant dense<0.000000e+00> : vector<48x9xf32>
    %67 = tpu.matmul %64, %66, %cst_41 {dimension_numbers = #tpu.dot_dimension_numbers<[1], [0], [0], [1], [0, 0, 1, 1], [], []>} : vector<48x9xbf16>, vector<9x9xbf16>, vector<48x9xf32> -> vector<48x9xf32>
    %68 = arith.addf %63, %67 : vector<48x9xf32>
    %69 = vector.extract_strided_slice %59 {offsets = [2, 0], sizes = [48, 9], strides = [1, 1]} : vector<56x9xbf16> to vector<48x9xbf16>
    %c2_42 = arith.constant 2 : index
    %c0_43 = arith.constant 0 : index
    %c0_44 = arith.constant 0 : index
    %70 = vector.load %arg5[%c2_42, %c0_43, %c0_44] : memref<9x9x9xbf16, #tpu.memory_space<vmem>>, vector<1x9x9xbf16>
    %71 = vector.shape_cast %70 : vector<1x9x9xbf16> to vector<9x9xbf16>
    %cst_45 = arith.constant dense<0.000000e+00> : vector<48x9xf32>
    %72 = tpu.matmul %69, %71, %cst_45 {dimension_numbers = #tpu.dot_dimension_numbers<[1], [0], [0], [1], [0, 0, 1, 1], [], []>} : vector<48x9xbf16>, vector<9x9xbf16>, vector<48x9xf32> -> vector<48x9xf32>
    %73 = arith.addf %68, %72 : vector<48x9xf32>
    %74 = vector.extract_strided_slice %59 {offsets = [3, 0], sizes = [48, 9], strides = [1, 1]} : vector<56x9xbf16> to vector<48x9xbf16>
    %c3_46 = arith.constant 3 : index
    %c0_47 = arith.constant 0 : index
    %c0_48 = arith.constant 0 : index
    %75 = vector.load %arg5[%c3_46, %c0_47, %c0_48] : memref<9x9x9xbf16, #tpu.memory_space<vmem>>, vector<1x9x9xbf16>
    %76 = vector.shape_cast %75 : vector<1x9x9xbf16> to vector<9x9xbf16>
    %cst_49 = arith.constant dense<0.000000e+00> : vector<48x9xf32>
    %77 = tpu.matmul %74, %76, %cst_49 {dimension_numbers = #tpu.dot_dimension_numbers<[1], [0], [0], [1], [0, 0, 1, 1], [], []>} : vector<48x9xbf16>, vector<9x9xbf16>, vector<48x9xf32> -> vector<48x9xf32>
    %78 = arith.addf %73, %77 : vector<48x9xf32>
    %79 = vector.extract_strided_slice %59 {offsets = [4, 0], sizes = [48, 9], strides = [1, 1]} : vector<56x9xbf16> to vector<48x9xbf16>
    %c4_50 = arith.constant 4 : index
    %c0_51 = arith.constant 0 : index
    %c0_52 = arith.constant 0 : index
    %80 = vector.load %arg5[%c4_50, %c0_51, %c0_52] : memref<9x9x9xbf16, #tpu.memory_space<vmem>>, vector<1x9x9xbf16>
    %81 = vector.shape_cast %80 : vector<1x9x9xbf16> to vector<9x9xbf16>
    %cst_53 = arith.constant dense<0.000000e+00> : vector<48x9xf32>
    %82 = tpu.matmul %79, %81, %cst_53 {dimension_numbers = #tpu.dot_dimension_numbers<[1], [0], [0], [1], [0, 0, 1, 1], [], []>} : vector<48x9xbf16>, vector<9x9xbf16>, vector<48x9xf32> -> vector<48x9xf32>
    %83 = arith.addf %78, %82 : vector<48x9xf32>
    %84 = vector.extract_strided_slice %59 {offsets = [5, 0], sizes = [48, 9], strides = [1, 1]} : vector<56x9xbf16> to vector<48x9xbf16>
    %c5_54 = arith.constant 5 : index
    %c0_55 = arith.constant 0 : index
    %c0_56 = arith.constant 0 : index
    %85 = vector.load %arg5[%c5_54, %c0_55, %c0_56] : memref<9x9x9xbf16, #tpu.memory_space<vmem>>, vector<1x9x9xbf16>
    %86 = vector.shape_cast %85 : vector<1x9x9xbf16> to vector<9x9xbf16>
    %cst_57 = arith.constant dense<0.000000e+00> : vector<48x9xf32>
    %87 = tpu.matmul %84, %86, %cst_57 {dimension_numbers = #tpu.dot_dimension_numbers<[1], [0], [0], [1], [0, 0, 1, 1], [], []>} : vector<48x9xbf16>, vector<9x9xbf16>, vector<48x9xf32> -> vector<48x9xf32>
    %88 = arith.addf %83, %87 : vector<48x9xf32>
    %89 = vector.extract_strided_slice %59 {offsets = [6, 0], sizes = [48, 9], strides = [1, 1]} : vector<56x9xbf16> to vector<48x9xbf16>
    %c6_58 = arith.constant 6 : index
    %c0_59 = arith.constant 0 : index
    %c0_60 = arith.constant 0 : index
    %90 = vector.load %arg5[%c6_58, %c0_59, %c0_60] : memref<9x9x9xbf16, #tpu.memory_space<vmem>>, vector<1x9x9xbf16>
    %91 = vector.shape_cast %90 : vector<1x9x9xbf16> to vector<9x9xbf16>
    %cst_61 = arith.constant dense<0.000000e+00> : vector<48x9xf32>
    %92 = tpu.matmul %89, %91, %cst_61 {dimension_numbers = #tpu.dot_dimension_numbers<[1], [0], [0], [1], [0, 0, 1, 1], [], []>} : vector<48x9xbf16>, vector<9x9xbf16>, vector<48x9xf32> -> vector<48x9xf32>
    %93 = arith.addf %88, %92 : vector<48x9xf32>
    %94 = vector.extract_strided_slice %59 {offsets = [7, 0], sizes = [48, 9], strides = [1, 1]} : vector<56x9xbf16> to vector<48x9xbf16>
    %c7_62 = arith.constant 7 : index
    %c0_63 = arith.constant 0 : index
    %c0_64 = arith.constant 0 : index
    %95 = vector.load %arg5[%c7_62, %c0_63, %c0_64] : memref<9x9x9xbf16, #tpu.memory_space<vmem>>, vector<1x9x9xbf16>
    %96 = vector.shape_cast %95 : vector<1x9x9xbf16> to vector<9x9xbf16>
    %cst_65 = arith.constant dense<0.000000e+00> : vector<48x9xf32>
    %97 = tpu.matmul %94, %96, %cst_65 {dimension_numbers = #tpu.dot_dimension_numbers<[1], [0], [0], [1], [0, 0, 1, 1], [], []>} : vector<48x9xbf16>, vector<9x9xbf16>, vector<48x9xf32> -> vector<48x9xf32>
    %98 = arith.addf %93, %97 : vector<48x9xf32>
    %99 = vector.extract_strided_slice %59 {offsets = [8, 0], sizes = [48, 9], strides = [1, 1]} : vector<56x9xbf16> to vector<48x9xbf16>
    %c8_66 = arith.constant 8 : index
    %c0_67 = arith.constant 0 : index
    %c0_68 = arith.constant 0 : index
    %100 = vector.load %arg5[%c8_66, %c0_67, %c0_68] : memref<9x9x9xbf16, #tpu.memory_space<vmem>>, vector<1x9x9xbf16>
    %101 = vector.shape_cast %100 : vector<1x9x9xbf16> to vector<9x9xbf16>
    %cst_69 = arith.constant dense<0.000000e+00> : vector<48x9xf32>
    %102 = tpu.matmul %99, %101, %cst_69 {dimension_numbers = #tpu.dot_dimension_numbers<[1], [0], [0], [1], [0, 0, 1, 1], [], []>} : vector<48x9xbf16>, vector<9x9xbf16>, vector<48x9xf32> -> vector<48x9xf32>
    %103 = arith.addf %98, %102 : vector<48x9xf32>
    %c0_70 = arith.constant 0 : index
    %c0_71 = arith.constant 0 : index
    %104 = vector.load %arg6[%c0_70, %c0_71] : memref<1x9xf32, #tpu.memory_space<vmem>>, vector<1x9xf32>
    %105 = vector.broadcast %104 : vector<1x9xf32> to vector<48x9xf32>
    %106 = arith.addf %103, %105 : vector<48x9xf32>
    %cst_72 = arith.constant 0.000000e+00 : f32
    %107 = vector.broadcast %cst_72 : f32 to vector<48x9xf32>
    %108 = arith.maximumf %106, %107 : vector<48x9xf32>
    %109 = arith.truncf %108 : vector<48x9xf32> to vector<48x9xbf16>
    %110 = vector.extract_strided_slice %109 {offsets = [0, 0], sizes = [38, 9], strides = [1, 1]} : vector<48x9xbf16> to vector<38x9xbf16>
    %c0_73 = arith.constant 0 : index
    %c0_74 = arith.constant 0 : index
    %c0_75 = arith.constant 0 : index
    %111 = vector.load %arg7[%c0_73, %c0_74, %c0_75] : memref<11x9x10xbf16, #tpu.memory_space<vmem>>, vector<1x9x10xbf16>
    %112 = vector.shape_cast %111 : vector<1x9x10xbf16> to vector<9x10xbf16>
    %cst_76 = arith.constant dense<0.000000e+00> : vector<38x10xf32>
    %113 = tpu.matmul %110, %112, %cst_76 {dimension_numbers = #tpu.dot_dimension_numbers<[1], [0], [0], [1], [0, 0, 1, 1], [], []>} : vector<38x9xbf16>, vector<9x10xbf16>, vector<38x10xf32> -> vector<38x10xf32>
    %114 = vector.extract_strided_slice %109 {offsets = [1, 0], sizes = [38, 9], strides = [1, 1]} : vector<48x9xbf16> to vector<38x9xbf16>
    %c1_77 = arith.constant 1 : index
    %c0_78 = arith.constant 0 : index
    %c0_79 = arith.constant 0 : index
    %115 = vector.load %arg7[%c1_77, %c0_78, %c0_79] : memref<11x9x10xbf16, #tpu.memory_space<vmem>>, vector<1x9x10xbf16>
    %116 = vector.shape_cast %115 : vector<1x9x10xbf16> to vector<9x10xbf16>
    %cst_80 = arith.constant dense<0.000000e+00> : vector<38x10xf32>
    %117 = tpu.matmul %114, %116, %cst_80 {dimension_numbers = #tpu.dot_dimension_numbers<[1], [0], [0], [1], [0, 0, 1, 1], [], []>} : vector<38x9xbf16>, vector<9x10xbf16>, vector<38x10xf32> -> vector<38x10xf32>
    %118 = arith.addf %113, %117 : vector<38x10xf32>
    %119 = vector.extract_strided_slice %109 {offsets = [2, 0], sizes = [38, 9], strides = [1, 1]} : vector<48x9xbf16> to vector<38x9xbf16>
    %c2_81 = arith.constant 2 : index
    %c0_82 = arith.constant 0 : index
    %c0_83 = arith.constant 0 : index
    %120 = vector.load %arg7[%c2_81, %c0_82, %c0_83] : memref<11x9x10xbf16, #tpu.memory_space<vmem>>, vector<1x9x10xbf16>
    %121 = vector.shape_cast %120 : vector<1x9x10xbf16> to vector<9x10xbf16>
    %cst_84 = arith.constant dense<0.000000e+00> : vector<38x10xf32>
    %122 = tpu.matmul %119, %121, %cst_84 {dimension_numbers = #tpu.dot_dimension_numbers<[1], [0], [0], [1], [0, 0, 1, 1], [], []>} : vector<38x9xbf16>, vector<9x10xbf16>, vector<38x10xf32> -> vector<38x10xf32>
    %123 = arith.addf %118, %122 : vector<38x10xf32>
    %124 = vector.extract_strided_slice %109 {offsets = [3, 0], sizes = [38, 9], strides = [1, 1]} : vector<48x9xbf16> to vector<38x9xbf16>
    %c3_85 = arith.constant 3 : index
    %c0_86 = arith.constant 0 : index
    %c0_87 = arith.constant 0 : index
    %125 = vector.load %arg7[%c3_85, %c0_86, %c0_87] : memref<11x9x10xbf16, #tpu.memory_space<vmem>>, vector<1x9x10xbf16>
    %126 = vector.shape_cast %125 : vector<1x9x10xbf16> to vector<9x10xbf16>
    %cst_88 = arith.constant dense<0.000000e+00> : vector<38x10xf32>
    %127 = tpu.matmul %124, %126, %cst_88 {dimension_numbers = #tpu.dot_dimension_numbers<[1], [0], [0], [1], [0, 0, 1, 1], [], []>} : vector<38x9xbf16>, vector<9x10xbf16>, vector<38x10xf32> -> vector<38x10xf32>
    %128 = arith.addf %123, %127 : vector<38x10xf32>
    %129 = vector.extract_strided_slice %109 {offsets = [4, 0], sizes = [38, 9], strides = [1, 1]} : vector<48x9xbf16> to vector<38x9xbf16>
    %c4_89 = arith.constant 4 : index
    %c0_90 = arith.constant 0 : index
    %c0_91 = arith.constant 0 : index
    %130 = vector.load %arg7[%c4_89, %c0_90, %c0_91] : memref<11x9x10xbf16, #tpu.memory_space<vmem>>, vector<1x9x10xbf16>
    %131 = vector.shape_cast %130 : vector<1x9x10xbf16> to vector<9x10xbf16>
    %cst_92 = arith.constant dense<0.000000e+00> : vector<38x10xf32>
    %132 = tpu.matmul %129, %131, %cst_92 {dimension_numbers = #tpu.dot_dimension_numbers<[1], [0], [0], [1], [0, 0, 1, 1], [], []>} : vector<38x9xbf16>, vector<9x10xbf16>, vector<38x10xf32> -> vector<38x10xf32>
    %133 = arith.addf %128, %132 : vector<38x10xf32>
    %134 = vector.extract_strided_slice %109 {offsets = [5, 0], sizes = [38, 9], strides = [1, 1]} : vector<48x9xbf16> to vector<38x9xbf16>
    %c5_93 = arith.constant 5 : index
    %c0_94 = arith.constant 0 : index
    %c0_95 = arith.constant 0 : index
    %135 = vector.load %arg7[%c5_93, %c0_94, %c0_95] : memref<11x9x10xbf16, #tpu.memory_space<vmem>>, vector<1x9x10xbf16>
    %136 = vector.shape_cast %135 : vector<1x9x10xbf16> to vector<9x10xbf16>
    %cst_96 = arith.constant dense<0.000000e+00> : vector<38x10xf32>
    %137 = tpu.matmul %134, %136, %cst_96 {dimension_numbers = #tpu.dot_dimension_numbers<[1], [0], [0], [1], [0, 0, 1, 1], [], []>} : vector<38x9xbf16>, vector<9x10xbf16>, vector<38x10xf32> -> vector<38x10xf32>
    %138 = arith.addf %133, %137 : vector<38x10xf32>
    %139 = vector.extract_strided_slice %109 {offsets = [6, 0], sizes = [38, 9], strides = [1, 1]} : vector<48x9xbf16> to vector<38x9xbf16>
    %c6_97 = arith.constant 6 : index
    %c0_98 = arith.constant 0 : index
    %c0_99 = arith.constant 0 : index
    %140 = vector.load %arg7[%c6_97, %c0_98, %c0_99] : memref<11x9x10xbf16, #tpu.memory_space<vmem>>, vector<1x9x10xbf16>
    %141 = vector.shape_cast %140 : vector<1x9x10xbf16> to vector<9x10xbf16>
    %cst_100 = arith.constant dense<0.000000e+00> : vector<38x10xf32>
    %142 = tpu.matmul %139, %141, %cst_100 {dimension_numbers = #tpu.dot_dimension_numbers<[1], [0], [0], [1], [0, 0, 1, 1], [], []>} : vector<38x9xbf16>, vector<9x10xbf16>, vector<38x10xf32> -> vector<38x10xf32>
    %143 = arith.addf %138, %142 : vector<38x10xf32>
    %144 = vector.extract_strided_slice %109 {offsets = [7, 0], sizes = [38, 9], strides = [1, 1]} : vector<48x9xbf16> to vector<38x9xbf16>
    %c7_101 = arith.constant 7 : index
    %c0_102 = arith.constant 0 : index
    %c0_103 = arith.constant 0 : index
    %145 = vector.load %arg7[%c7_101, %c0_102, %c0_103] : memref<11x9x10xbf16, #tpu.memory_space<vmem>>, vector<1x9x10xbf16>
    %146 = vector.shape_cast %145 : vector<1x9x10xbf16> to vector<9x10xbf16>
    %cst_104 = arith.constant dense<0.000000e+00> : vector<38x10xf32>
    %147 = tpu.matmul %144, %146, %cst_104 {dimension_numbers = #tpu.dot_dimension_numbers<[1], [0], [0], [1], [0, 0, 1, 1], [], []>} : vector<38x9xbf16>, vector<9x10xbf16>, vector<38x10xf32> -> vector<38x10xf32>
    %148 = arith.addf %143, %147 : vector<38x10xf32>
    %149 = vector.extract_strided_slice %109 {offsets = [8, 0], sizes = [38, 9], strides = [1, 1]} : vector<48x9xbf16> to vector<38x9xbf16>
    %c8_105 = arith.constant 8 : index
    %c0_106 = arith.constant 0 : index
    %c0_107 = arith.constant 0 : index
    %150 = vector.load %arg7[%c8_105, %c0_106, %c0_107] : memref<11x9x10xbf16, #tpu.memory_space<vmem>>, vector<1x9x10xbf16>
    %151 = vector.shape_cast %150 : vector<1x9x10xbf16> to vector<9x10xbf16>
    %cst_108 = arith.constant dense<0.000000e+00> : vector<38x10xf32>
    %152 = tpu.matmul %149, %151, %cst_108 {dimension_numbers = #tpu.dot_dimension_numbers<[1], [0], [0], [1], [0, 0, 1, 1], [], []>} : vector<38x9xbf16>, vector<9x10xbf16>, vector<38x10xf32> -> vector<38x10xf32>
    %153 = arith.addf %148, %152 : vector<38x10xf32>
    %154 = vector.extract_strided_slice %109 {offsets = [9, 0], sizes = [38, 9], strides = [1, 1]} : vector<48x9xbf16> to vector<38x9xbf16>
    %c9 = arith.constant 9 : index
    %c0_109 = arith.constant 0 : index
    %c0_110 = arith.constant 0 : index
    %155 = vector.load %arg7[%c9, %c0_109, %c0_110] : memref<11x9x10xbf16, #tpu.memory_space<vmem>>, vector<1x9x10xbf16>
    %156 = vector.shape_cast %155 : vector<1x9x10xbf16> to vector<9x10xbf16>
    %cst_111 = arith.constant dense<0.000000e+00> : vector<38x10xf32>
    %157 = tpu.matmul %154, %156, %cst_111 {dimension_numbers = #tpu.dot_dimension_numbers<[1], [0], [0], [1], [0, 0, 1, 1], [], []>} : vector<38x9xbf16>, vector<9x10xbf16>, vector<38x10xf32> -> vector<38x10xf32>
    %158 = arith.addf %153, %157 : vector<38x10xf32>
    %159 = vector.extract_strided_slice %109 {offsets = [10, 0], sizes = [38, 9], strides = [1, 1]} : vector<48x9xbf16> to vector<38x9xbf16>
    %c10 = arith.constant 10 : index
    %c0_112 = arith.constant 0 : index
    %c0_113 = arith.constant 0 : index
    %160 = vector.load %arg7[%c10, %c0_112, %c0_113] : memref<11x9x10xbf16, #tpu.memory_space<vmem>>, vector<1x9x10xbf16>
    %161 = vector.shape_cast %160 : vector<1x9x10xbf16> to vector<9x10xbf16>
    %cst_114 = arith.constant dense<0.000000e+00> : vector<38x10xf32>
    %162 = tpu.matmul %159, %161, %cst_114 {dimension_numbers = #tpu.dot_dimension_numbers<[1], [0], [0], [1], [0, 0, 1, 1], [], []>} : vector<38x9xbf16>, vector<9x10xbf16>, vector<38x10xf32> -> vector<38x10xf32>
    %163 = arith.addf %158, %162 : vector<38x10xf32>
    %c0_115 = arith.constant 0 : index
    %c0_116 = arith.constant 0 : index
    %164 = vector.load %arg8[%c0_115, %c0_116] : memref<1x10xf32, #tpu.memory_space<vmem>>, vector<1x10xf32>
    %165 = vector.broadcast %164 : vector<1x10xf32> to vector<38x10xf32>
    %166 = arith.addf %163, %165 : vector<38x10xf32>
    %cst_117 = arith.constant 0.000000e+00 : f32
    %167 = vector.broadcast %cst_117 : f32 to vector<38x10xf32>
    %168 = arith.maximumf %166, %167 : vector<38x10xf32>
    %169 = arith.truncf %168 : vector<38x10xf32> to vector<38x10xbf16>
    %170 = vector.extract_strided_slice %169 {offsets = [0, 0], sizes = [6, 10], strides = [1, 1]} : vector<38x10xbf16> to vector<6x10xbf16>
    %171 = vector.extract_strided_slice %169 {offsets = [32, 0], sizes = [6, 10], strides = [1, 1]} : vector<38x10xbf16> to vector<6x10xbf16>
    %172 = tpu.concatenate %170, %171 in 0 : vector<6x10xbf16>, vector<6x10xbf16> -> vector<12x10xbf16>
    %173 = vector.extract_strided_slice %172 {offsets = [0, 0], sizes = [7, 10], strides = [1, 1]} : vector<12x10xbf16> to vector<7x10xbf16>
    %c0_118 = arith.constant 0 : index
    %c0_119 = arith.constant 0 : index
    %c0_120 = arith.constant 0 : index
    %174 = vector.load %arg9[%c0_118, %c0_119, %c0_120] : memref<6x10x435xbf16, #tpu.memory_space<vmem>>, vector<1x10x435xbf16>
    %175 = vector.shape_cast %174 : vector<1x10x435xbf16> to vector<10x435xbf16>
    %cst_121 = arith.constant dense<0.000000e+00> : vector<7x435xf32>
    %176 = tpu.matmul %173, %175, %cst_121 {dimension_numbers = #tpu.dot_dimension_numbers<[1], [0], [0], [1], [0, 0, 1, 1], [], []>} : vector<7x10xbf16>, vector<10x435xbf16>, vector<7x435xf32> -> vector<7x435xf32>
    %177 = vector.extract_strided_slice %172 {offsets = [1, 0], sizes = [7, 10], strides = [1, 1]} : vector<12x10xbf16> to vector<7x10xbf16>
    %c1_122 = arith.constant 1 : index
    %c0_123 = arith.constant 0 : index
    %c0_124 = arith.constant 0 : index
    %178 = vector.load %arg9[%c1_122, %c0_123, %c0_124] : memref<6x10x435xbf16, #tpu.memory_space<vmem>>, vector<1x10x435xbf16>
    %179 = vector.shape_cast %178 : vector<1x10x435xbf16> to vector<10x435xbf16>
    %cst_125 = arith.constant dense<0.000000e+00> : vector<7x435xf32>
    %180 = tpu.matmul %177, %179, %cst_125 {dimension_numbers = #tpu.dot_dimension_numbers<[1], [0], [0], [1], [0, 0, 1, 1], [], []>} : vector<7x10xbf16>, vector<10x435xbf16>, vector<7x435xf32> -> vector<7x435xf32>
    %181 = arith.addf %176, %180 : vector<7x435xf32>
    %182 = vector.extract_strided_slice %172 {offsets = [2, 0], sizes = [7, 10], strides = [1, 1]} : vector<12x10xbf16> to vector<7x10xbf16>
    %c2_126 = arith.constant 2 : index
    %c0_127 = arith.constant 0 : index
    %c0_128 = arith.constant 0 : index
    %183 = vector.load %arg9[%c2_126, %c0_127, %c0_128] : memref<6x10x435xbf16, #tpu.memory_space<vmem>>, vector<1x10x435xbf16>
    %184 = vector.shape_cast %183 : vector<1x10x435xbf16> to vector<10x435xbf16>
    %cst_129 = arith.constant dense<0.000000e+00> : vector<7x435xf32>
    %185 = tpu.matmul %182, %184, %cst_129 {dimension_numbers = #tpu.dot_dimension_numbers<[1], [0], [0], [1], [0, 0, 1, 1], [], []>} : vector<7x10xbf16>, vector<10x435xbf16>, vector<7x435xf32> -> vector<7x435xf32>
    %186 = arith.addf %181, %185 : vector<7x435xf32>
    %187 = vector.extract_strided_slice %172 {offsets = [3, 0], sizes = [7, 10], strides = [1, 1]} : vector<12x10xbf16> to vector<7x10xbf16>
    %c3_130 = arith.constant 3 : index
    %c0_131 = arith.constant 0 : index
    %c0_132 = arith.constant 0 : index
    %188 = vector.load %arg9[%c3_130, %c0_131, %c0_132] : memref<6x10x435xbf16, #tpu.memory_space<vmem>>, vector<1x10x435xbf16>
    %189 = vector.shape_cast %188 : vector<1x10x435xbf16> to vector<10x435xbf16>
    %cst_133 = arith.constant dense<0.000000e+00> : vector<7x435xf32>
    %190 = tpu.matmul %187, %189, %cst_133 {dimension_numbers = #tpu.dot_dimension_numbers<[1], [0], [0], [1], [0, 0, 1, 1], [], []>} : vector<7x10xbf16>, vector<10x435xbf16>, vector<7x435xf32> -> vector<7x435xf32>
    %191 = arith.addf %186, %190 : vector<7x435xf32>
    %192 = vector.extract_strided_slice %172 {offsets = [4, 0], sizes = [7, 10], strides = [1, 1]} : vector<12x10xbf16> to vector<7x10xbf16>
    %c4_134 = arith.constant 4 : index
    %c0_135 = arith.constant 0 : index
    %c0_136 = arith.constant 0 : index
    %193 = vector.load %arg9[%c4_134, %c0_135, %c0_136] : memref<6x10x435xbf16, #tpu.memory_space<vmem>>, vector<1x10x435xbf16>
    %194 = vector.shape_cast %193 : vector<1x10x435xbf16> to vector<10x435xbf16>
    %cst_137 = arith.constant dense<0.000000e+00> : vector<7x435xf32>
    %195 = tpu.matmul %192, %194, %cst_137 {dimension_numbers = #tpu.dot_dimension_numbers<[1], [0], [0], [1], [0, 0, 1, 1], [], []>} : vector<7x10xbf16>, vector<10x435xbf16>, vector<7x435xf32> -> vector<7x435xf32>
    %196 = arith.addf %191, %195 : vector<7x435xf32>
    %197 = vector.extract_strided_slice %172 {offsets = [5, 0], sizes = [7, 10], strides = [1, 1]} : vector<12x10xbf16> to vector<7x10xbf16>
    %c5_138 = arith.constant 5 : index
    %c0_139 = arith.constant 0 : index
    %c0_140 = arith.constant 0 : index
    %198 = vector.load %arg9[%c5_138, %c0_139, %c0_140] : memref<6x10x435xbf16, #tpu.memory_space<vmem>>, vector<1x10x435xbf16>
    %199 = vector.shape_cast %198 : vector<1x10x435xbf16> to vector<10x435xbf16>
    %cst_141 = arith.constant dense<0.000000e+00> : vector<7x435xf32>
    %200 = tpu.matmul %197, %199, %cst_141 {dimension_numbers = #tpu.dot_dimension_numbers<[1], [0], [0], [1], [0, 0, 1, 1], [], []>} : vector<7x10xbf16>, vector<10x435xbf16>, vector<7x435xf32> -> vector<7x435xf32>
    %201 = arith.addf %196, %200 : vector<7x435xf32>
    %c0_142 = arith.constant 0 : index
    %c0_143 = arith.constant 0 : index
    %202 = vector.load %arg10[%c0_142, %c0_143] : memref<1x435xf32, #tpu.memory_space<vmem>>, vector<1x435xf32>
    %203 = vector.broadcast %202 : vector<1x435xf32> to vector<7x435xf32>
    %204 = arith.addf %201, %203 : vector<7x435xf32>
    %cst_144 = arith.constant 0.000000e+00 : f32
    %205 = vector.broadcast %cst_144 : f32 to vector<7x435xf32>
    %206 = arith.maximumf %204, %205 : vector<7x435xf32>
    %207 = arith.truncf %206 : vector<7x435xf32> to vector<7x435xbf16>
    %208 = vector.extract_strided_slice %207 {offsets = [0, 0], sizes = [1, 435], strides = [1, 1]} : vector<7x435xbf16> to vector<1x435xbf16>
    %209 = vector.extract_strided_slice %207 {offsets = [6, 0], sizes = [1, 435], strides = [1, 1]} : vector<7x435xbf16> to vector<1x435xbf16>
    %210 = tpu.concatenate %208, %209 in 0 : vector<1x435xbf16>, vector<1x435xbf16> -> vector<2x435xbf16>
    %c0_145 = arith.constant 0 : index
    %c0_146 = arith.constant 0 : index
    %211 = vector.load %arg11[%c0_145, %c0_146] : memref<435x16xbf16, #tpu.memory_space<vmem>>, vector<435x16xbf16>
    %cst_147 = arith.constant dense<0.000000e+00> : vector<2x16xf32>
    %212 = tpu.matmul %210, %211, %cst_147 {dimension_numbers = #tpu.dot_dimension_numbers<[1], [0], [0], [1], [0, 0, 1, 1], [], []>} : vector<2x435xbf16>, vector<435x16xbf16>, vector<2x16xf32> -> vector<2x16xf32>
    %c0_148 = arith.constant 0 : index
    %c0_149 = arith.constant 0 : index
    %213 = vector.load %arg12[%c0_148, %c0_149] : memref<1x16xf32, #tpu.memory_space<vmem>>, vector<1x16xf32>
    %214 = vector.broadcast %213 : vector<1x16xf32> to vector<2x16xf32>
    %215 = arith.addf %212, %214 : vector<2x16xf32>
    %c0_150 = arith.constant 0 : index
    %c0_151 = arith.constant 0 : index
    %216 = vector.load %arg13[%c0_150, %c0_151] : memref<2x16xf32, #tpu.memory_space<vmem>>, vector<2x16xf32>
    tpu.vector_store %arg13[%c0_150, %c0_151], %215 {strides = array<i32>} : memref<2x16xf32, #tpu.memory_space<vmem>>, vector<2x16xf32>,
    return
  }
  func.func @transform_0(%arg0: i32) -> (i32, i32) {
    %c0_i32 = arith.constant 0 : i32
    %c0_i32_0 = arith.constant 0 : i32
    %c0_i32_1 = arith.constant 0 : i32
    return %c0_i32, %c0_i32_0 : i32, i32
  }
  func.func @transform_1(%arg0: i32) -> (i32, i32) {
    %c0_i32 = arith.constant 0 : i32
    %c0_i32_0 = arith.constant 0 : i32
    %c0_i32_1 = arith.constant 0 : i32
    return %c0_i32, %c0_i32_0 : i32, i32
  }
  func.func @transform_2(%arg0: i32) -> (i32, i32, i32) {
    %c0_i32 = arith.constant 0 : i32
    %c0_i32_0 = arith.constant 0 : i32
    %c0_i32_1 = arith.constant 0 : i32
    %c0_i32_2 = arith.constant 0 : i32
    return %c0_i32, %c0_i32_0, %c0_i32_1 : i32, i32, i32
  }
  func.func @transform_3(%arg0: i32) -> (i32, i32) {
    %c0_i32 = arith.constant 0 : i32
    %c0_i32_0 = arith.constant 0 : i32
    %c0_i32_1 = arith.constant 0 : i32
    return %c0_i32, %c0_i32_0 : i32, i32
  }
  func.func @transform_4(%arg0: i32) -> (i32, i32, i32) {
    %c0_i32 = arith.constant 0 : i32
    %c0_i32_0 = arith.constant 0 : i32
    %c0_i32_1 = arith.constant 0 : i32
    %c0_i32_2 = arith.constant 0 : i32
    return %c0_i32, %c0_i32_0, %c0_i32_1 : i32, i32, i32
  }
  func.func @transform_5(%arg0: i32) -> (i32, i32) {
    %c0_i32 = arith.constant 0 : i32
    %c0_i32_0 = arith.constant 0 : i32
    %c0_i32_1 = arith.constant 0 : i32
    return %c0_i32, %c0_i32_0 : i32, i32
  }
  func.func @transform_6(%arg0: i32) -> (i32, i32, i32) {
    %c0_i32 = arith.constant 0 : i32
    %c0_i32_0 = arith.constant 0 : i32
    %c0_i32_1 = arith.constant 0 : i32
    %c0_i32_2 = arith.constant 0 : i32
    return %c0_i32, %c0_i32_0, %c0_i32_1 : i32, i32, i32
  }
  func.func @transform_7(%arg0: i32) -> (i32, i32) {
    %c0_i32 = arith.constant 0 : i32
    %c0_i32_0 = arith.constant 0 : i32
    %c0_i32_1 = arith.constant 0 : i32
    return %c0_i32, %c0_i32_0 : i32, i32
  }
  func.func @transform_8(%arg0: i32) -> (i32, i32, i32) {
    %c0_i32 = arith.constant 0 : i32
    %c0_i32_0 = arith.constant 0 : i32
    %c0_i32_1 = arith.constant 0 : i32
    %c0_i32_2 = arith.constant 0 : i32
    return %c0_i32, %c0_i32_0, %c0_i32_1 : i32, i32, i32
  }
  func.func @transform_9(%arg0: i32) -> (i32, i32) {
    %c0_i32 = arith.constant 0 : i32
    %c0_i32_0 = arith.constant 0 : i32
    %c0_i32_1 = arith.constant 0 : i32
    return %c0_i32, %c0_i32_0 : i32, i32
  }
  func.func @transform_10(%arg0: i32) -> (i32, i32) {
    %c0_i32 = arith.constant 0 : i32
    %c0_i32_0 = arith.constant 0 : i32
    %c0_i32_1 = arith.constant 0 : i32
    return %c0_i32, %c0_i32_0 : i32, i32
  }
  func.func @transform_11(%arg0: i32) -> (i32, i32) {
    %c0_i32 = arith.constant 0 : i32
    %c0_i32_0 = arith.constant 0 : i32
    %c0_i32_1 = arith.constant 0 : i32
    return %c0_i32, %c0_i32_0 : i32, i32
  }
  func.func @transform_12(%arg0: i32) -> (i32, i32) {
    %c0_i32 = arith.constant 0 : i32
    %c0_i32_0 = arith.constant 0 : i32
    %c0_i32_1 = arith.constant 0 : i32
    return %c0_i32, %c0_i32_0 : i32, i32
  }
}

</mosaic_0001>

<bundles_post_ra>
// kernel: cnn_encoder_forward.1
= control target key start
LH: loop header
LB: loop body
LE: loop exit
PB: predicated region body
PF: predicated region fallthrough
CT: control target
= control target key end

     0   :  { %v5061_v0 = vmov 0   ;;  %vm129_vm0 = vcmask 1041408   ;;  %vm3765_vm1 = vcmask 1040384   ;;  %v5062_v9 = vmov 65535   ;;  %s6225_s0 = inlined_call_operand.vmem [shape: s32[64,1], index: 0, kind: input, shape index: {}]   ;;  %s6226_s1 = inlined_call_operand.vmem [shape: bf16[20,16], index: 1, kind: input, shape index: {}]   ;;  %s6227_s2 = inlined_call_operand.vmem [shape: bf16[9,16,9], index: 2, kind: input, shape index: {}]   ;;  %s6228_s4 = inlined_call_operand.vmem [shape: bf16[9,9,9], index: 4, kind: input, shape index: {}]   ;;  %s6229_s3 = inlined_call_operand.vmem [shape: f32[1,9], index: 3, kind: input, shape index: {}]   ;;  %s6230_s6 = inlined_call_operand.vmem [shape: bf16[11,9,10], index: 6, kind: input, shape index: {}]   ;;  %s6231_s5 = inlined_call_operand.vmem [shape: f32[1,9], index: 5, kind: input, shape index: {}]   ;;  %s6232_s8 = inlined_call_operand.vmem [shape: bf16[6,10,435], index: 8, kind: input, shape index: {}]   ;;  %s6233_s7 = inlined_call_operand.vmem [shape: f32[1,10], index: 7, kind: input, shape index: {}]   ;;  %s6234_s10 = inlined_call_operand.vmem [shape: bf16[435,16], index: 10, kind: input, shape index: {}]   ;;  %s6235_s9 = inlined_call_operand.vmem [shape: f32[1,435], index: 9, kind: input, shape index: {}]   ;;  %s6236_s11 = inlined_call_operand.vmem [shape: f32[1,16], index: 11, kind: input, shape index: {}]   ;;  %s6237_s12 = inlined_call_operand.vmem [shape: f32[2,16], index: 12, kind: output, shape index: {}]  }
   0x1   :  { %4965 = vset.pattern.permute.xlu1 %v5061_v0  ;;  %4964 = vset.pattern.permute.xlu0 %v5061_v0  ;;  %v44_v1 = vld [vmem:[%s6225_s0 + $0x10] sm:$0xff]  ;;  %v42_v2 = vld [vmem:[%s6225_s0] sm:$0xff]  ;;  %v45_v3 = vld [vmem:[%s6225_s0 + $0x18] sm:$0xff]  ;;  %v4004_v10 = vsel %vm3765_vm1, 4294967295, %v5062_v9  ;;  %v5063_v15 = vmov 0.0   ;;  %v50_v16 = vlaneseq  ;;  %vm116_vm6 = vcmask 162816  }
   0x2   :  { %59 = vperm.xlu1 %4965, %v44_v1   ;;  %53 = vperm.xlu0 %4964, %v42_v2   ;;  %v43_v4 = vld [vmem:[%s6225_s0 + $0x8] sm:$0xff]  ;;  %v4966_v5 = vld [vmem:[%s6226_s1] sm:$0xff]   ;;  %v5158_v12 = vsel %vm129_vm0, %v4004_v10, 0  ;;  %v49_v13 = vld [vmem:[%s6225_s0 + $0x38] sm:$0xff]  ;;  %vm407_vm11 = vcmask 1046528   ;;  %vm615_vm12 = vcmask 1045504  }
   0x3   :  { %v4967_v6 = vld [vmem:[%s6226_s1 + $0x8] ss:$0 sps:$4 sm:$0x33]   ;;  %v46_v8 = vld [vmem:[%s6225_s0 + $0x20] sm:$0xff]  ;;  %4540 = vmatprep.subr.bf16.mxu0 %v4966_v5  ;;  %4922 = vmatprep.subr.bf16.mxu1 %v4966_v5  ;;  %v48_v14 = vld [vmem:[%s6225_s0 + $0x30] sm:$0xff]  ;;  %v51_v17 = vand.u32 127, %v50_v16 }
   0x4   :  { %v47_v7 = vld [vmem:[%s6225_s0 + $0x28] sm:$0xff]  ;;  %4541 = vmatpush3.bf16.msra.mxu0 %v4966_v5  ;;  %4924 = vmatpush3.bf16.msra.mxu1 %v4966_v5  ;;  %v131_v11 = vsel %vm129_vm0, %v4967_v6, 0  ;;  %v5186_v39 = vld [vmem:[%s6227_s2] sm:$0xff]   ;;  %vm207_vm13 = vsmask.f32 7424  ;;  %vm245_vm14 = vcmask 130048  }
   0x5   :  { %4958 = vmatprep.subr.msk.bf16.mxu0 %vm129_vm0, %v4967_v6  ;;  %4959 = vmatprep.subr.msk.bf16.mxu1 %vm129_vm0, %v4967_v6  ;;  %v4968_v38 = vld [vmem:[%s6227_s2 + $0x8] sm:$0xff]   ;;  %vm507_vm15 = vsmask.f32 6400  ;;  %vm715_vm0 = vsmask.f32 5376 }
   0x6   :  { %62 = vperm.xlu1 %4965, %v45_v3   ;;  %56 = vperm.xlu0 %4964, %v43_v4  }
   0x8   :  { %4543 = vmatpush3.bf16.msra.mxu0 %v131_v11  ;;  %4925 = vmatpush3.bf16.msra.mxu1 %v131_v11 }
   0x9   :  { %4642 = vmatprep.subr.bf16.mxu0 %v5063_v15  ;;  %4552 = vmatprep.subr.bf16.mxu1 %v4968_v38 }
   0xa   :  { %68 = vperm.xlu1 %4965, %v47_v7   ;;  %65 = vperm.xlu0 %4964, %v46_v8  }
   0xe   :  { %74 = vperm.xlu1 %4965, %v49_v13   ;;  %71 = vperm.xlu0 %4964, %v48_v14  }
  0x81   :  { %v60_v18 = vpop.permute.xlu1 %59  ;;  %v54_v19 = vpop.permute.xlu0 %53 }
  0x82   :  { %vm78_vm2 = vcmp.eq.s32.totalorder %v60_v18, %v51_v17  ;;  %vm76_vm3 = vcmp.eq.s32.totalorder %v54_v19, %v51_v17 }
  0x83   :  { %v4097_v22 = vsel %vm78_vm2, 1.0, %v5063_v15  ;;  %v4095_v23 = vsel %vm76_vm3, 1.0, %v5063_v15  ;;  %vm823_vm2 = vcmask 1044480   ;;  %vm1031_vm3 = vcmask 1043456  }
  0x85   :  { %v63_v20 = vpop.permute.xlu1 %62  ;;  %v57_v21 = vpop.permute.xlu0 %56 }
  0x86   :  { %vm79_vm4 = vcmp.eq.s32.totalorder %v63_v20, %v51_v17  ;;  %vm77_vm5 = vcmp.eq.s32.totalorder %v57_v21, %v51_v17 }
  0x87   :  { %v4098_v24 = vsel %vm79_vm4, 1.0, %v5063_v15  ;;  %v4096_v25 = vsel %vm77_vm5, 1.0, %v5063_v15  ;;  %vm923_vm4 = vsmask.f32 4352  ;;  %vm5064_vm5 = vmmov 0  }
  0x88   :  { %v101_v26 = vpack.c.bf16 %v4098_v24, %v4097_v22  ;;  %v100_v27 = vpack.c.bf16 %v4096_v25, %v4095_v23 }
  0x89   :  { %v69_v28 = vpop.permute.xlu1 %68  ;;  %v66_v29 = vpop.permute.xlu0 %65 }
  0x8a   :  { %vm81_vm7 = vcmp.eq.s32.totalorder %v69_v28, %v51_v17  ;;  %vm80_vm8 = vcmp.eq.s32.totalorder %v66_v29, %v51_v17  ;;  %4544 = vmatprep.mubr.msk.bf16.mxu0 %vm116_vm6, %v100_v27 }
  0x8b   :  { %v4100_v30 = vsel %vm81_vm7, 1.0, %v5063_v15  ;;  %v4099_v31 = vsel %vm80_vm8, 1.0, %v5063_v15  ;;  %4545 = vmatmul.mubr.msk.bf16.vlgmr.msra.gmra.mrb[0].mxu0 %vm116_vm6, %v101_v26  ;;  %vm2783_vm7 = vsmask.f32 3328  ;;  %vm2872_vm8 = vcmask 1042432  }
  0x8c   :  { %v102_v32 = vpack.c.bf16 %v4100_v30, %v4099_v31  ;;  %4644 = vmatprep.mubr.msk.bf16.mxu0 %vm5064_vm5, %v5063_v15 }
  0x8d   :  { %v75_v33 = vpop.permute.xlu1 %74  ;;  %v72_v34 = vpop.permute.xlu0 %71 }
  0x8e   :  { %vm83_vm9 = vcmp.eq.s32.totalorder %v75_v33, %v51_v17  ;;  %vm82_vm10 = vcmp.eq.s32.totalorder %v72_v34, %v51_v17  ;;  %4548 = vmatprep.mubr.msk.bf16.mxu1 %vm116_vm6, %v102_v32 }
  0x8f   :  { %v4102_v35 = vsel %vm83_vm9, 1.0, %v5063_v15  ;;  %v4101_v36 = vsel %vm82_vm10, 1.0, %v5063_v15  ;;  %vm3004_vm9 = vcmask 80896   ;;  %vm3766_vm10 = vsmask.f32 256 }
  0x90   :  { %v103_v37 = vpack.c.bf16 %v4102_v35, %v4101_v36  ;;  %v4970_v36 = vld [vmem:[%s6227_s2 + $0x10] sm:$0xff]  }
  0x92   :  { %4549 = vmatmul.mubr.msk.bf16.vlgmr.msra.gmra.mrb[0].mxu1 %vm116_vm6, %v103_v37  ;;  %vm1191_vm6 = vcmask 72704  }
  0x93   :  { %4553 = vmatpush3.bf16.msra.mxu1 %v4968_v38 }
  0x94   :  { %4562 = vmatprep.subr.bf16.mxu1 %v5186_v39 }
 0x15e   :  { %v4546_v40 = vpop.f32.mrb[0].mxu0 }
 0x15f   :  { %v167_v41 = vpop.f32.mrb[1].mxu0 }
 0x160   :  { %v4547_v42 = vpop.f32.mrb[2].mxu0 }
 0x161   :  { %v5189_v43 = vpack.c.bf16 %v4547_v42, %v4546_v40  ;;  %v170_v44 = vpop.f32.mrb[3].mxu0 }
 0x162   :  { %v5191_v45 = vpack.c.bf16 %v170_v44, %v167_v41 }
 0x163   :  { %v5194_v46 = vshll.u32 %v5189_v43, 16  ;;  %v5197_v47 = vshrl.u32 %v5189_v43, 16  ;;  %v409_v48 = vrot.slane %v5189_v43, 1  ;;  %v617_v49 = vrot.slane %v5189_v43, 2 }
 0x164   :  { %v5202_v50 = vshrl.u32 %v5191_v45, 16  ;;  %v5205_v51 = vshll.u32 %v5191_v45, 16  ;;  %v408_v52 = vrot.slane %v5191_v45, 1  ;;  %v616_v53 = vrot.slane %v5191_v45, 2 }
 0x165   :  { %v4550_v54 = vpop.f32.mrb[0].mxu1  ;;  %v218_v55 = vrot.slane %v5194_v46, 1  ;;  %v511_v56 = vrot.slane %v5197_v47, 1  ;;  %v512_v57 = vrot.slane %v5194_v46, 2  ;;  %v719_v58 = vrot.slane %v5197_v47, 2 }
 0x166   :  { %v183_v59 = vpop.f32.mrb[1].mxu1  ;;  %v213_v60 = vrot.slane %v5205_v51, 1  ;;  %v5215_v61 = vsel %vm407_vm11, %v408_v52, %v409_v48  ;;  %v508_v62 = vrot.slane %v5202_v50, 1  ;;  %v509_v63 = vrot.slane %v5205_v51, 2 }
 0x167   :  { %v4551_v1 = vpop.f32.mrb[2].mxu1  ;;  %v222_v2 = vor.u32 %v5197_v47, %v218_v55  ;;  %v513_v3 = vor.u32 %v512_v57, %v511_v56  ;;  %v5221_v4 = vsel %vm615_vm12, %v616_v53, %v617_v49  ;;  %v716_v5 = vrot.slane %v5202_v50, 2 }
 0x168   :  { %v5224_v6 = vpack.c.bf16 %v4551_v1, %v4550_v54  ;;  %v186_v7 = vpop.f32.mrb[3].mxu1  ;;  %v214_v8 = vor.u32 %v213_v60, %v5202_v50  ;;  %v510_v10 = vor.u32 %v509_v63, %v508_v62  ;;  %v717_v11 = vrot.slane %v5205_v51, 3 }
 0x169   :  { %v5228_v13 = vpack.c.bf16 %v186_v7, %v183_v59  ;;  %v720_v14 = vrot.slane %v5194_v46, 3  ;;  %v824_v17 = vrot.slane %v5191_v45, 3  ;;  %v825_v18 = vrot.slane %v5189_v43, 3 }
 0x16a   :  { %v219_v19 = vsel %vm207_vm13, %v214_v8, %v218_v55  ;;  %v5235_v20 = vshll.u32 %v5224_v6, 16  ;;  %v5238_v21 = vshrl.u32 %v5224_v6, 16  ;;  %v413_v22 = vrot.slane %v5224_v6, 1 }
 0x16b   :  { %4554 = vmatprep.mubr.msk.bf16.mxu1 %vm245_vm14, %v219_v19  ;;  %v224_v23 = vshll.u32 %v5228_v13, 16  ;;  %v228_v24 = vshrl.u32 %v5228_v13, 16  ;;  %v411_v25 = vrot.slane %v5228_v13, 1  ;;  %v5246_v26 = vsel %vm507_vm15, %v510_v10, %v513_v3 }
 0x16c   :  { %v234_v27 = vrot.slane %v5235_v20, 1  ;;  %v519_v28 = vrot.slane %v5238_v21, 1  ;;  %v520_v29 = vrot.slane %v5235_v20, 2  ;;  %v619_v30 = vrot.slane %v5228_v13, 2 }
 0x16d   :  { %v226_v31 = vrot.slane %v224_v23, 1  ;;  %v5253_v32 = vsel %vm407_vm11, %v409_v48, %v411_v25  ;;  %v5258_v33 = vsel %vm407_vm11, %v411_v25, %v413_v22  ;;  %v515_v34 = vrot.slane %v228_v24, 1 }
 0x16e   :  { %v238_v35 = vor.u32 %v5238_v21, %v234_v27  ;;  %v516_v37 = vrot.slane %v224_v23, 2  ;;  %v5264_v38 = vor.u32 %v520_v29, %v519_v28  ;;  %v5267_v40 = vsel %vm615_vm12, %v617_v49, %v619_v30 }
 0x16f   :  { %v227_v41 = vsel %vm207_vm13, %v222_v2, %v226_v31  ;;  %v230_v42 = vor.u32 %v228_v24, %v226_v31  ;;  %v621_v44 = vrot.slane %v5224_v6, 2  ;;  %v718_v48 = vor.u32 %v717_v11, %v716_v5 }
 0x170   :  { %4555 = vmatmul.mubr.msk.bf16.vlgmr.msra.gmra.mrb[4].mxu1 %vm245_vm14, %v227_v41  ;;  %v517_v52 = vor.u32 %v516_v37, %v515_v34  ;;  %v721_v53 = vor.u32 %v720_v14, %v719_v58  ;;  %v723_v54 = vrot.slane %v228_v24, 2  ;;  %v724_v55 = vrot.slane %v224_v23, 3  ;;  %v4971_v41 = vld [vmem:[%s6227_s2 + $0x18] sm:$0xff]  }
 0x171   :  { %4563 = vmatpush3.bf16.msra.mxu1 %v5186_v39  ;;  %v235_v56 = vsel %vm207_vm13, %v230_v42, %v234_v27  ;;  %v5277_v49 = vsel %vm615_vm12, %v619_v30, %v621_v44  ;;  %v727_v57 = vrot.slane %v5238_v21, 2  ;;  %v728_v59 = vrot.slane %v5235_v20, 3 }
 0x172   :  { %4558 = vmatprep.mubr.msk.bf16.mxu1 %vm245_vm14, %v235_v56  ;;  %4572 = vmatprep.subr.bf16.mxu1 %v4970_v36  ;;  %v518_v58 = vsel %vm507_vm15, %v513_v3, %v517_v52  ;;  %v522_v60 = vsel %vm507_vm15, %v517_v52, %v5264_v38  ;;  %v722_v39 = vsel %vm715_vm0, %v718_v48, %v721_v53  ;;  %v827_v62 = vrot.slane %v5228_v13, 3 }
 0x173   :  { %v725_v63 = vor.u32 %v724_v55, %v723_v54  ;;  %v5287_v1 = vor.u32 %v728_v59, %v727_v57  ;;  %v5290_v2 = vsel %vm823_vm2, %v824_v17, %v825_v18  ;;  %v829_v5 = vrot.slane %v5224_v6, 3 }
 0x174   :  { %v5294_v7 = vsel %vm823_vm2, %v825_v18, %v827_v62  ;;  %v924_v3 = vrot.slane %v5202_v50, 3  ;;  %v925_v8 = vrot.slane %v5205_v51, 4  ;;  %v927_v10 = vrot.slane %v5197_v47, 3 }
 0x175   :  { %v726_v11 = vsel %vm715_vm0, %v721_v53, %v725_v63  ;;  %v730_v14 = vsel %vm715_vm0, %v725_v63, %v5287_v1  ;;  %v830_v17 = vsel %vm823_vm2, %v827_v62, %v829_v5  ;;  %v928_v19 = vrot.slane %v5194_v46, 4 }
 0x176   :  { %v926_v25 = vor.u32 %v925_v8, %v924_v3  ;;  %v931_v18 = vrot.slane %v228_v24, 3  ;;  %v932_v27 = vrot.slane %v224_v23, 4  ;;  %v935_v50 = vrot.slane %v5238_v21, 3 }
 0x177   :  { %v929_v28 = vor.u32 %v928_v19, %v927_v10  ;;  %v936_v51 = vrot.slane %v5235_v20, 4  ;;  %v1032_v47 = vrot.slane %v5191_v45, 4  ;;  %v1033_v29 = vrot.slane %v5189_v43, 4 }
 0x178   :  { %4559 = vmatmul.mubr.msk.bf16.gmra.mrb[8].mxu1 %vm245_vm14, %v238_v35  ;;  %v933_v30 = vor.u32 %v932_v27, %v931_v18  ;;  %v1035_v31 = vrot.slane %v5228_v13, 4  ;;  %v1037_v34 = vrot.slane %v5224_v6, 4 }
 0x179   :  { %4564 = vmatprep.mubr.msk.bf16.mxu1 %vm245_vm14, %v5191_v45  ;;  %v930_v46 = vsel %vm923_vm4, %v926_v25, %v929_v28  ;;  %v937_v21 = vor.u32 %v936_v51, %v935_v50  ;;  %v1034_v23 = vsel %vm1031_vm3, %v1032_v47, %v1033_v29  ;;  %v4972_v45 = vld [vmem:[%s6227_s2 + $0x20] sm:$0xff]  }
 0x17a   :  { %v934_v20 = vsel %vm923_vm4, %v929_v28, %v933_v30  ;;  %v1036_v24 = vsel %vm1031_vm3, %v1033_v29, %v1035_v31  ;;  %v1038_v37 = vsel %vm1031_vm3, %v1035_v31, %v1037_v34 }
 0x17b   :  { %v938_v35 = vsel %vm923_vm4, %v933_v30, %v937_v21 }
 0x180   :  { %4565 = vmatmul.mubr.msk.bf16.vlgmr.msra.gmra.mrb[4].mxu1 %vm245_vm14, %v5189_v43  ;;  %v4973_v43 = vld [vmem:[%s6227_s2 + $0x28] sm:$0xff]  }
 0x181   :  { %4573 = vmatpush3.bf16.msra.mxu1 %v4970_v36  ;;  %4568 = vmatprep.mubr.msk.bf16.mxu1 %vm245_vm14, %v5228_v13  ;;  %v4976_v13 = vld [vmem:[%s6227_s2 + $0x40] sm:$0xff]  }
 0x182   :  { %4582 = vmatprep.subr.bf16.mxu1 %v4971_v41 }
 0x188   :  { %4569 = vmatmul.mubr.msk.bf16.gmra.mrb[12].mxu1 %vm245_vm14, %v5224_v6 }
 0x189   :  { %4574 = vmatprep.mubr.msk.bf16.mxu1 %vm245_vm14, %v5215_v61  ;;  %v4974_v61 = vld [vmem:[%s6227_s2 + $0x30] sm:$0xff]  }
 0x190   :  { %4575 = vmatmul.mubr.msk.bf16.vlgmr.msra.gmra.mrb[4].mxu1 %vm245_vm14, %v5253_v32 }
 0x191   :  { %4583 = vmatpush3.bf16.msra.mxu1 %v4971_v41  ;;  %4578 = vmatprep.mubr.msk.bf16.mxu1 %vm245_vm14, %v5258_v33  ;;  %v1203_v33 = vsel %vm1031_vm3, 4294967295, %v5062_v9 }
 0x192   :  { %4592 = vmatprep.subr.bf16.mxu1 %v4972_v45  ;;  %v5394_v36 = vsel %vm823_vm2, %v1203_v33, 0 }
 0x198   :  { %4579 = vmatmul.mubr.msk.bf16.gmra.mrb[16].mxu1 %vm245_vm14, %v413_v22 }
 0x199   :  { %4584 = vmatprep.mubr.msk.bf16.mxu1 %vm245_vm14, %v5246_v26 }
 0x1a0   :  { %4585 = vmatmul.mubr.msk.bf16.vlgmr.msra.gmra.mrb[4].mxu1 %vm245_vm14, %v518_v58 }
 0x1a1   :  { %4593 = vmatpush3.bf16.msra.mxu1 %v4972_v45  ;;  %4588 = vmatprep.mubr.msk.bf16.mxu1 %vm245_vm14, %v522_v60 }
 0x1a2   :  { %4602 = vmatprep.subr.bf16.mxu1 %v4973_v43 }
 0x1a8   :  { %4589 = vmatmul.mubr.msk.bf16.gmra.mrb[20].mxu1 %vm245_vm14, %v5264_v38  ;;  %v4977_v38 = vld [vmem:[%s6228_s4 + $0x8] sm:$0x1f]  }
 0x1a9   :  { %4594 = vmatprep.mubr.msk.bf16.mxu1 %vm245_vm14, %v5221_v4  ;;  %v4975_v4 = vld [vmem:[%s6227_s2 + $0x38] sm:$0xff]   ;;  %v1206_v42 = vand.u32 %v4977_v38, %v5394_v36 }
 0x1ab   :  { %4643 = vmatpush3.bf16.msra.mxu0 %v1206_v42 }
 0x1ac   :  { %4656 = vmatprep.subr.bf16.mxu0 %v5063_v15 }
 0x1b0   :  { %4595 = vmatmul.mubr.msk.bf16.vlgmr.msra.gmra.mrb[4].mxu1 %vm245_vm14, %v5267_v40  ;;  %v4978_v40 = vld [vmem:[%s6228_s4 + $0x30] sm:$0x1f]  }
 0x1b1   :  { %4603 = vmatpush3.bf16.msra.mxu1 %v4973_v43  ;;  %4598 = vmatprep.mubr.msk.bf16.mxu1 %vm245_vm14, %v5277_v49 }
 0x1b2   :  { %4612 = vmatprep.subr.bf16.mxu1 %v4974_v61 }
 0x1b8   :  { %4599 = vmatmul.mubr.msk.bf16.gmra.mrb[24].mxu1 %vm245_vm14, %v621_v44  ;;  %v1743_v44 = vand.u32 %v4978_v40, %v5394_v36 }
 0x1b9   :  { %4604 = vmatprep.mubr.msk.bf16.mxu1 %vm245_vm14, %v722_v39 }
 0x1c0   :  { %4605 = vmatmul.mubr.msk.bf16.vlgmr.msra.gmra.mrb[4].mxu1 %vm245_vm14, %v726_v11 }
 0x1c1   :  { %4613 = vmatpush3.bf16.msra.mxu1 %v4974_v61  ;;  %4608 = vmatprep.mubr.msk.bf16.mxu1 %vm245_vm14, %v730_v14 }
 0x1c2   :  { %4622 = vmatprep.subr.bf16.mxu1 %v4975_v4 }
 0x1c8   :  { %4609 = vmatmul.mubr.msk.bf16.gmra.mrb[28].mxu1 %vm245_vm14, %v5287_v1 }
 0x1c9   :  { %4614 = vmatprep.mubr.msk.bf16.mxu1 %vm245_vm14, %v5290_v2 }
 0x1d0   :  { %4615 = vmatmul.mubr.msk.bf16.vlgmr.msra.gmra.mrb[4].mxu1 %vm245_vm14, %v5294_v7 }
 0x1d1   :  { %4623 = vmatpush3.bf16.msra.mxu1 %v4975_v4  ;;  %4618 = vmatprep.mubr.msk.bf16.mxu1 %vm245_vm14, %v830_v17 }
 0x1d2   :  { %4632 = vmatprep.subr.bf16.mxu1 %v4976_v13 }
 0x1d8   :  { %4619 = vmatmul.mubr.msk.bf16.gmra.mrb[32].mxu1 %vm245_vm14, %v829_v5 }
 0x1d9   :  { %4624 = vmatprep.mubr.msk.bf16.mxu1 %vm245_vm14, %v930_v46 }
 0x1e0   :  { %4625 = vmatmul.mubr.msk.bf16.vlgmr.msra.gmra.mrb[4].mxu1 %vm245_vm14, %v934_v20 }
 0x1e1   :  { %4633 = vmatpush3.bf16.msra.mxu1 %v4976_v13  ;;  %4628 = vmatprep.mubr.msk.bf16.mxu1 %vm245_vm14, %v938_v35  ;;  %v4170_v13 = vld [vmem:[%s6229_s3] ss:$0 sm:$0xff] }
 0x1e2   :  { %4726 = vmatprep.subr.bf16.mxu1 %v5063_v15 }
 0x1e8   :  { %4629 = vmatmul.mubr.msk.bf16.gmra.mrb[36].mxu1 %vm245_vm14, %v937_v21 }
 0x1e9   :  { %4634 = vmatprep.mubr.msk.bf16.mxu1 %vm245_vm14, %v1034_v23 }
 0x1f0   :  { %4635 = vmatmul.mubr.msk.bf16.vlgmr.msra.gmra.mrb[4].mxu1 %vm245_vm14, %v1036_v24 }
 0x1f1   :  { %4638 = vmatprep.mubr.msk.bf16.mxu1 %vm245_vm14, %v1038_v37  ;;  %4727 = vmatpush3.bf16.msra.mxu1 %v1743_v44  ;;  %v4979_v44 = vld [vmem:[%s6228_s4] sm:$0x1f]  }
 0x1f2   :  { %4754 = vmatprep.subr.bf16.mxu1 %v5063_v15 }
 0x1f8   :  { %4639 = vmatmul.mubr.msk.bf16.gmra.mrb[40].mxu1 %vm245_vm14, %v1037_v34 }
 0x1f9   :  { %4728 = vmatprep.mubr.msk.bf16.mxu1 %vm5064_vm5, %v5063_v15 }
 0x24b   :  { %v4560_v6 = vpop.f32.mrb[8].mxu1 }
 0x24c   :  { %v308_v22 = vpop.f32.mrb[9].mxu1 }
 0x24d   :  { %v4561_v26 = vpop.f32.mrb[10].mxu1 }
 0x24e   :  { %v311_v32 = vpop.f32.mrb[11].mxu1 }
 0x25b   :  { %v4570_v9 = vpop.f32.mrb[12].mxu1 }
 0x25c   :  { %v395_v48 = vadd.f32 %v4570_v9, %v4560_v6  ;;  %v386_v52 = vpop.f32.mrb[13].mxu1  ;;  %v4980_v9 = vld [vmem:[%s6228_s4 + $0x40] sm:$0x1f]  }
 0x25d   :  { %v387_v53 = vadd.f32 %v386_v52, %v308_v22  ;;  %v4571_v54 = vpop.f32.mrb[14].mxu1 }
 0x25e   :  { %v389_v55 = vpop.f32.mrb[15].mxu1 }
 0x25f   :  { %v390_v56 = vadd.f32 %v389_v55, %v311_v32 }
 0x26b   :  { %v4580_v49 = vpop.f32.mrb[16].mxu1 }
 0x26c   :  { %v503_v57 = vadd.f32 %v4580_v49, %v395_v48  ;;  %v483_v59 = vpop.f32.mrb[17].mxu1 }
 0x26d   :  { %v501_v58 = vadd.f32 %v483_v59, %v387_v53  ;;  %v4581_v60 = vpop.f32.mrb[18].mxu1  ;;  %v1931_v59 = vand.u32 %v4980_v9, %v5394_v36 }
 0x26e   :  { %v486_v39 = vpop.f32.mrb[19].mxu1 }
 0x26f   :  { %v502_v62 = vadd.f32 %v486_v39, %v390_v56 }
 0x27b   :  { %v4590_v63 = vpop.f32.mrb[20].mxu1 }
 0x27c   :  { %v611_v1 = vadd.f32 %v4590_v63, %v503_v57  ;;  %v591_v2 = vpop.f32.mrb[21].mxu1  ;;  %v1277_v57 = vand.u32 %v4979_v44, %v5394_v36 }
 0x27d   :  { %v609_v5 = vadd.f32 %v591_v2, %v501_v58  ;;  %v4591_v7 = vpop.f32.mrb[22].mxu1 }
 0x27e   :  { %v594_v3 = vpop.f32.mrb[23].mxu1 }
 0x27f   :  { %v610_v8 = vadd.f32 %v594_v3, %v502_v62 }
 0x28b   :  { %v4600_v10 = vpop.f32.mrb[24].mxu1 }
 0x28c   :  { %v711_v11 = vadd.f32 %v4600_v10, %v611_v1  ;;  %v691_v14 = vpop.f32.mrb[25].mxu1 }
 0x28d   :  { %v709_v17 = vadd.f32 %v691_v14, %v609_v5  ;;  %v4601_v19 = vpop.f32.mrb[26].mxu1 }
 0x28e   :  { %v694_v25 = vpop.f32.mrb[27].mxu1 }
 0x28f   :  { %v710_v18 = vadd.f32 %v694_v25, %v610_v8 }
 0x29b   :  { %v4610_v27 = vpop.f32.mrb[28].mxu1 }
 0x29c   :  { %v819_v50 = vadd.f32 %v4610_v27, %v711_v11  ;;  %v799_v28 = vpop.f32.mrb[29].mxu1 }
 0x29d   :  { %v817_v51 = vadd.f32 %v799_v28, %v709_v17  ;;  %v4611_v47 = vpop.f32.mrb[30].mxu1 }
 0x29e   :  { %v802_v29 = vpop.f32.mrb[31].mxu1 }
 0x29f   :  { %v818_v30 = vadd.f32 %v802_v29, %v710_v18 }
 0x2ab   :  { %v4620_v31 = vpop.f32.mrb[32].mxu1 }
 0x2ac   :  { %v919_v34 = vadd.f32 %v4620_v31, %v819_v50  ;;  %v899_v46 = vpop.f32.mrb[33].mxu1 }
 0x2ad   :  { %v917_v21 = vadd.f32 %v899_v46, %v817_v51  ;;  %v4621_v23 = vpop.f32.mrb[34].mxu1 }
 0x2ae   :  { %v902_v20 = vpop.f32.mrb[35].mxu1 }
 0x2af   :  { %v918_v24 = vadd.f32 %v902_v20, %v818_v30 }
 0x2bb   :  { %v4630_v37 = vpop.f32.mrb[36].mxu1 }
 0x2bc   :  { %v1027_v35 = vadd.f32 %v4630_v37, %v919_v34  ;;  %v1007_v41 = vpop.f32.mrb[37].mxu1 }
 0x2bd   :  { %v1025_v45 = vadd.f32 %v1007_v41, %v917_v21  ;;  %v4631_v43 = vpop.f32.mrb[38].mxu1 }
 0x2be   :  { %v1010_v61 = vpop.f32.mrb[39].mxu1 }
 0x2bf   :  { %v1026_v4 = vadd.f32 %v1010_v61, %v918_v24 }
 0x2c3   :  { %v4636_v6 = vpop.f32.mrb[4].mxu1 }
 0x2c4   :  { %v1137_v22 = vadd.f32 %v4636_v6, %v4170_v13  ;;  %v1091_v26 = vpop.f32.mrb[5].mxu1 }
 0x2c5   :  { %v1135_v32 = vadd.f32 %v4170_v13, %v1091_v26  ;;  %v4637_v33 = vpop.f32.mrb[6].mxu1 }
 0x2c6   :  { %v1138_v38 = vadd.f32 %v4637_v33, %v4170_v13  ;;  %v1094_v40 = vpop.f32.mrb[7].mxu1  ;;  %v1144_v48 = vmax.f32 %v1137_v22, 0.0 }
 0x2c7   :  { %v1136_v42 = vadd.f32 %v4170_v13, %v1094_v40  ;;  %v1142_v53 = vmax.f32 %v1135_v32, 0.0 }
 0x2c8   :  { %v1145_v52 = vmax.f32 %v1138_v38, 0.0 }
 0x2c9   :  { %v1143_v54 = vmax.f32 %v1136_v42, 0.0 }
 0x2ca   :  { %v5419_v55 = vpack.c.bf16 %v1145_v52, %v1144_v48 }
 0x2cb   :  { %v5421_v56 = vpack.c.bf16 %v1143_v54, %v1142_v53  ;;  %v4640_v49 = vpop.f32.mrb[40].mxu1 }
 0x2cc   :  { %v1127_v58 = vadd.f32 %v4640_v49, %v1027_v35  ;;  %v1107_v60 = vpop.f32.mrb[41].mxu1  ;;  %v1722_v39 = vrot.slane %v5419_v55, 3  ;;  %v5427_v62 = vshll.u32 %v5419_v55, 16  ;;  %v5430_v63 = vshrl.u32 %v5419_v55, 16 }
 0x2cd   :  { %v1125_v1 = vadd.f32 %v1107_v60, %v1025_v45  ;;  %v4641_v2 = vpop.f32.mrb[42].mxu1  ;;  %v1721_v5 = vrot.slane %v5421_v56, 3  ;;  %v5434_v7 = vshrl.u32 %v5421_v56, 16  ;;  %v5437_v3 = vshll.u32 %v5421_v56, 16 }
 0x2ce   :  { %v1141_v8 = vadd.f32 %v4170_v13, %v1127_v58  ;;  %v1110_v10 = vpop.f32.mrb[43].mxu1  ;;  %v1168_v11 = vrot.slane %v5427_v62, 1  ;;  %v1909_v14 = vrot.slane %v5421_v56, 4  ;;  %v1910_v17 = vrot.slane %v5419_v55, 4 }
 0x2cf   :  { %v1139_v19 = vadd.f32 %v4170_v13, %v1125_v1  ;;  %v1126_v25 = vadd.f32 %v1110_v10, %v1026_v4  ;;  %v1723_v18 = vsel %vm823_vm2, %v1721_v5, %v1722_v39  ;;  %v1163_v27 = vrot.slane %v5437_v3, 1 }
 0x2d0   :  { %v1148_v50 = vmax.f32 %v1141_v8, 0.0  ;;  %4729 = vmatmul.mubr.msk.bf16.vlgmr.msra.gmra.mrb[44].mxu1 %vm1191_vm6, %v1723_v18  ;;  %v1172_v28 = vor.u32 %v5430_v63, %v1168_v11  ;;  %v5447_v51 = vsel %vm1031_vm3, %v1909_v14, %v1910_v17  ;;  %v1343_v47 = vrot.slane %v5421_v56, 1 }
 0x2d1   :  { %v1146_v29 = vmax.f32 %v1139_v19, 0.0  ;;  %v1140_v30 = vadd.f32 %v4170_v13, %v1126_v25  ;;  %v1164_v31 = vor.u32 %v1163_v27, %v5434_v7  ;;  %4732 = vmatprep.mubr.msk.bf16.mxu1 %vm5064_vm5, %v5063_v15  ;;  %4755 = vmatpush3.bf16.msra.mxu1 %v1931_v59  ;;  %v1344_v34 = vrot.slane %v5419_v55, 1 }
 0x2d2   :  { %v1152_v46 = vpack.c.bf16 %v1148_v50, %v1148_v50  ;;  %v1433_v21 = vrot.slane %v5434_v7, 1  ;;  %v1434_v23 = vrot.slane %v5437_v3, 2  ;;  %v1436_v20 = vrot.slane %v5430_v63, 1  ;;  %4782 = vmatprep.subr.bf16.mxu1 %v5063_v15 }
 0x2d3   :  { %v1147_v24 = vmax.f32 %v1140_v30, 0.0  ;;  %v1169_v37 = vsel %vm207_vm13, %v1164_v31, %v1168_v11  ;;  %v5460_v35 = vsel %vm407_vm11, %v1343_v47, %v1344_v34  ;;  %v1437_v41 = vrot.slane %v5427_v62, 2 }
 0x2d4   :  { %4645 = vmatmul.mubr.msk.bf16.vlgmr.msra.gmra.mrb[4].mxu0 %vm1191_vm6, %v1169_v37  ;;  %v1726_v45 = vrot.slane %v1152_v46, 3  ;;  %v5464_v43 = vshll.u32 %v1152_v46, 16  ;;  %v1914_v61 = vrot.slane %v1152_v46, 4  ;;  %v1348_v4 = vrot.slane %v1152_v46, 1 }
 0x2d5   :  { %v5466_v13 = vpack.c.bf16 %v1147_v24, %v1146_v29  ;;  %4657 = vmatpush3.bf16.msra.mxu0 %v1277_v57  ;;  %4648 = vmatprep.mubr.msk.bf16.mxu0 %vm5064_vm5, %v5063_v15  ;;  %v1435_v6 = vor.u32 %v1434_v23, %v1433_v21  ;;  %v1438_v22 = vor.u32 %v1437_v41, %v1436_v20  ;;  %v5470_v26 = vshrl.u32 %v1152_v46, 16 }
 0x2d6   :  { %v1184_v32 = vrot.slane %v5464_v43, 1  ;;  %4670 = vmatprep.subr.bf16.mxu0 %v5063_v15  ;;  %v1447_v33 = vrot.slane %v5464_v43, 2  ;;  %v1533_v38 = vrot.slane %v5421_v56, 2  ;;  %v1534_v40 = vrot.slane %v5419_v55, 2 }
 0x2d7   :  { %v1724_v42 = vrot.slane %v5466_v13, 3  ;;  %v1174_v44 = vshll.u32 %v5466_v13, 16  ;;  %v1178_v9 = vshrl.u32 %v5466_v13, 16  ;;  %v1912_v48 = vrot.slane %v5466_v13, 4 }
 0x2d8   :  { %v1346_v52 = vrot.slane %v5466_v13, 1  ;;  %v5483_v53 = vsel %vm507_vm15, %v1435_v6, %v1438_v22  ;;  %v1446_v54 = vrot.slane %v5470_v26, 1  ;;  %v5487_v49 = vsel %vm615_vm12, %v1533_v38, %v1534_v40 }
 0x2d9   :  { %v1725_v57 = vsel %vm823_vm2, %v1722_v39, %v1724_v42  ;;  %v1176_v59 = vrot.slane %v1174_v44, 1  ;;  %v1727_v58 = vsel %vm823_vm2, %v1724_v42, %v1726_v45  ;;  %v5492_v60 = vsel %vm1031_vm3, %v1910_v17, %v1912_v48 }
 0x2da   :  { %4733 = vmatmul.mubr.msk.bf16.gmra.mrb[48].mxu1 %vm1191_vm6, %v1725_v57  ;;  %v5496_v1 = vsel %vm1031_vm3, %v1912_v48, %v1914_v61  ;;  %v5499_v2 = vsel %vm407_vm11, %v1344_v34, %v1346_v52  ;;  %v5502_v5 = vsel %vm407_vm11, %v1346_v52, %v1348_v4  ;;  %v1440_v8 = vrot.slane %v1178_v9, 1 }
 0x2db   :  { %v1177_v39 = vsel %vm207_vm13, %v1172_v28, %v1176_v59  ;;  %4736 = vmatprep.mubr.msk.bf16.mxu1 %vm5064_vm5, %v5063_v15  ;;  %v1180_v10 = vor.u32 %v1178_v9, %v1176_v59  ;;  %v1441_v11 = vrot.slane %v1174_v44, 2  ;;  %v1448_v14 = vor.u32 %v1447_v33, %v1446_v54 }
 0x2dc   :  { %4649 = vmatmul.mubr.msk.bf16.gmra.mrb[8].mxu0 %vm1191_vm6, %v1177_v39  ;;  %v1536_v17 = vrot.slane %v5466_v13, 2  ;;  %v1538_v19 = vrot.slane %v1152_v46, 2  ;;  %v1623_v25 = vrot.slane %v5434_v7, 2  ;;  %v1624_v18 = vrot.slane %v5437_v3, 3 }
 0x2dd   :  { %4652 = vmatprep.mubr.msk.bf16.mxu0 %vm5064_vm5, %v5063_v15  ;;  %v1185_v27 = vsel %vm207_vm13, %v1180_v10, %v1184_v32  ;;  %v1442_v50 = vor.u32 %v1441_v11, %v1440_v8  ;;  %v1626_v28 = vrot.slane %v5430_v63, 2  ;;  %v1627_v47 = vrot.slane %v5427_v62, 3 }
 0x2de   :  { %v5517_v29 = vsel %vm615_vm12, %v1534_v40, %v1536_v17  ;;  %v5520_v30 = vsel %vm615_vm12, %v1536_v17, %v1538_v19  ;;  %v1625_v31 = vor.u32 %v1624_v18, %v1623_v25  ;;  %v1630_v23 = vrot.slane %v1178_v9, 2 }
 0x2df   :  { %v5523_v34 = vsel %vm507_vm15, %v1438_v22, %v1442_v50  ;;  %v5526_v46 = vsel %vm507_vm15, %v1442_v50, %v1448_v14  ;;  %v1628_v21 = vor.u32 %v1627_v47, %v1626_v28  ;;  %v1631_v20 = vrot.slane %v1174_v44, 3 }
 0x2e0   :  { %v1634_v24 = vrot.slane %v5470_v26, 2  ;;  %v1635_v37 = vrot.slane %v5464_v43, 3  ;;  %v1811_v41 = vrot.slane %v5434_v7, 3  ;;  %v1812_v61 = vrot.slane %v5437_v3, 4 }
 0x2e1   :  { %v5532_v45 = vsel %vm715_vm0, %v1625_v31, %v1628_v21  ;;  %v1814_v4 = vrot.slane %v5430_v63, 3  ;;  %v1815_v6 = vrot.slane %v5427_v62, 4  ;;  %v1632_v22 = vor.u32 %v1631_v20, %v1630_v23 }
 0x2e2   :  { %4737 = vmatmul.mubr.msk.bf16.gmra.mrb[52].mxu1 %vm1191_vm6, %v1727_v58  ;;  %v1636_v32 = vor.u32 %v1635_v37, %v1634_v24  ;;  %v1818_v33 = vrot.slane %v1178_v9, 3  ;;  %v1819_v38 = vrot.slane %v1174_v44, 4  ;;  %v1813_v40 = vor.u32 %v1812_v61, %v1811_v41  ;;  %v4981_v44 = vld [vmem:[%s6228_s4 + $0x10] sm:$0x1f]  }
 0x2e3   :  { %4756 = vmatprep.mubr.msk.bf16.mxu1 %vm5064_vm5, %v5063_v15  ;;  %v1816_v7 = vor.u32 %v1815_v6, %v1814_v4  ;;  %v1822_v42 = vrot.slane %v5470_v26, 3  ;;  %v1823_v48 = vrot.slane %v5464_v43, 4  ;;  %v1633_v63 = vsel %vm715_vm0, %v1628_v21, %v1632_v22 }
 0x2e4   :  { %4653 = vmatmul.mubr.msk.bf16.gmra.mrb[12].mxu0 %vm1191_vm6, %v1185_v27  ;;  %v1637_v62 = vsel %vm715_vm0, %v1632_v22, %v1636_v32  ;;  %v1820_v3 = vor.u32 %v1819_v38, %v1818_v33  ;;  %v1365_v54 = vand.u32 %v4981_v44, %v5394_v36  ;;  %v4986_v22 = vld [vmem:[%s6230_s6 + $0x8] sm:$0x1f]  }
 0x2e5   :  { %4658 = vmatprep.mubr.msk.bf16.mxu0 %vm5064_vm5, %v5063_v15  ;;  %v1817_v9 = vsel %vm923_vm4, %v1813_v40, %v1816_v7  ;;  %v1824_v52 = vor.u32 %v1823_v48, %v1822_v42  ;;  %v2061_v33 = vand.u32 %v4986_v22, %v5394_v36 }
 0x2e6   :  { %v1821_v26 = vsel %vm923_vm4, %v1816_v7, %v1820_v3 }
 0x2e7   :  { %v1825_v43 = vsel %vm923_vm4, %v1820_v3, %v1824_v52 }
 0x2ea   :  { %4757 = vmatmul.mubr.msk.bf16.vlgmr.msra.gmra.mrb[56].mxu1 %vm1191_vm6, %v5447_v51  ;;  %v4983_v51 = vld [vmem:[%s6228_s4 + $0x20] sm:$0x1f]  }
 0x2eb   :  { %4760 = vmatprep.mubr.msk.bf16.mxu1 %vm5064_vm5, %v5063_v15 }
 0x2ec   :  { %4659 = vmatmul.mubr.msk.bf16.vlgmr.msra.gmra.mrb[16].mxu0 %vm1191_vm6, %v5421_v56  ;;  %v4982_v56 = vld [vmem:[%s6228_s4 + $0x18] sm:$0x1f]  }
 0x2ed   :  { %4671 = vmatpush3.bf16.msra.mxu0 %v1365_v54  ;;  %4662 = vmatprep.mubr.msk.bf16.mxu0 %vm5064_vm5, %v5063_v15 }
 0x2ee   :  { %4684 = vmatprep.subr.bf16.mxu0 %v5063_v15 }
 0x2f2   :  { %4761 = vmatmul.mubr.msk.bf16.gmra.mrb[60].mxu1 %vm1191_vm6, %v5492_v60 }
 0x2f3   :  { %4764 = vmatprep.mubr.msk.bf16.mxu1 %vm5064_vm5, %v5063_v15 }
 0x2f4   :  { %4663 = vmatmul.mubr.msk.bf16.gmra.mrb[20].mxu0 %vm1191_vm6, %v5419_v55  ;;  %v1465_v55 = vand.u32 %v4982_v56, %v5394_v36 }
 0x2f5   :  { %4666 = vmatprep.mubr.msk.bf16.mxu0 %vm5064_vm5, %v5063_v15 }
 0x2fa   :  { %4765 = vmatmul.mubr.msk.bf16.gmra.mrb[64].mxu1 %vm1191_vm6, %v5496_v1 }
 0x2fb   :  { %4784 = vmatprep.mubr.msk.bf16.mxu1 %vm5064_vm5, %v5063_v15 }
 0x2fc   :  { %4667 = vmatmul.mubr.msk.bf16.gmra.mrb[24].mxu0 %vm1191_vm6, %v5466_v13  ;;  %v4984_v13 = vld [vmem:[%s6228_s4 + $0x28] sm:$0x1f]  }
 0x2fd   :  { %4672 = vmatprep.mubr.msk.bf16.mxu0 %vm5064_vm5, %v5063_v15 }
 0x304   :  { %4673 = vmatmul.mubr.msk.bf16.vlgmr.msra.gmra.mrb[28].mxu0 %vm1191_vm6, %v5460_v35  ;;  %v1555_v35 = vand.u32 %v4983_v51, %v5394_v36 }
 0x305   :  { %4685 = vmatpush3.bf16.msra.mxu0 %v1465_v55  ;;  %4676 = vmatprep.mubr.msk.bf16.mxu0 %vm5064_vm5, %v5063_v15 }
 0x306   :  { %4698 = vmatprep.subr.bf16.mxu0 %v5063_v15 }
 0x30c   :  { %4677 = vmatmul.mubr.msk.bf16.gmra.mrb[32].mxu0 %vm1191_vm6, %v5499_v2 }
 0x30d   :  { %4680 = vmatprep.mubr.msk.bf16.mxu0 %vm5064_vm5, %v5063_v15 }
 0x314   :  { %4681 = vmatmul.mubr.msk.bf16.gmra.mrb[36].mxu0 %vm1191_vm6, %v5502_v5 }
 0x315   :  { %4686 = vmatprep.mubr.msk.bf16.mxu0 %vm5064_vm5, %v5063_v15 }
 0x31c   :  { %4687 = vmatmul.mubr.msk.bf16.vlgmr.msra.gmra.mrb[40].mxu0 %vm1191_vm6, %v5483_v53  ;;  %v1653_v53 = vand.u32 %v4984_v13, %v5394_v36 }
 0x31d   :  { %4699 = vmatpush3.bf16.msra.mxu0 %v1555_v35  ;;  %4690 = vmatprep.mubr.msk.bf16.mxu0 %vm5064_vm5, %v5063_v15 }
 0x31e   :  { %4712 = vmatprep.subr.bf16.mxu0 %v5063_v15 }
 0x324   :  { %4691 = vmatmul.mubr.msk.bf16.gmra.mrb[44].mxu0 %vm1191_vm6, %v5523_v34 }
 0x325   :  { %4694 = vmatprep.mubr.msk.bf16.mxu0 %vm5064_vm5, %v5063_v15 }
 0x32c   :  { %4695 = vmatmul.mubr.msk.bf16.gmra.mrb[48].mxu0 %vm1191_vm6, %v5526_v46 }
 0x32d   :  { %4700 = vmatprep.mubr.msk.bf16.mxu0 %vm5064_vm5, %v5063_v15 }
 0x334   :  { %4701 = vmatmul.mubr.msk.bf16.vlgmr.msra.gmra.mrb[52].mxu0 %vm1191_vm6, %v5487_v49  ;;  %v4985_v49 = vld [vmem:[%s6228_s4 + $0x38] sm:$0x1f]  }
 0x335   :  { %4713 = vmatpush3.bf16.msra.mxu0 %v1653_v53  ;;  %4704 = vmatprep.mubr.msk.bf16.mxu0 %vm5064_vm5, %v5063_v15  ;;  %v1841_v57 = vand.u32 %v4985_v49, %v5394_v36 }
 0x336   :  { %4740 = vmatprep.subr.bf16.mxu0 %v5063_v15 }
 0x33c   :  { %4705 = vmatmul.mubr.msk.bf16.gmra.mrb[56].mxu0 %vm1191_vm6, %v5517_v29 }
 0x33d   :  { %4708 = vmatprep.mubr.msk.bf16.mxu0 %vm5064_vm5, %v5063_v15 }
 0x344   :  { %4709 = vmatmul.mubr.msk.bf16.gmra.mrb[60].mxu0 %vm1191_vm6, %v5520_v30 }
 0x345   :  { %4714 = vmatprep.mubr.msk.bf16.mxu0 %vm5064_vm5, %v5063_v15 }
 0x34c   :  { %4715 = vmatmul.mubr.msk.bf16.vlgmr.msra.gmra.mrb[64].mxu0 %vm1191_vm6, %v5532_v45 }
 0x34d   :  { %4741 = vmatpush3.bf16.msra.mxu0 %v1841_v57  ;;  %4718 = vmatprep.mubr.msk.bf16.mxu0 %vm5064_vm5, %v5063_v15 }
 0x34e   :  { %4768 = vmatprep.subr.bf16.mxu0 %v5063_v15 }
 0x354   :  { %4719 = vmatmul.mubr.msk.bf16.gmra.mrb[68].mxu0 %vm1191_vm6, %v1633_v63 }
 0x355   :  { %4722 = vmatprep.mubr.msk.bf16.mxu0 %vm5064_vm5, %v5063_v15 }
 0x35c   :  { %4723 = vmatmul.mubr.msk.bf16.gmra.mrb[72].mxu0 %vm1191_vm6, %v1637_v62 }
 0x35d   :  { %4742 = vmatprep.mubr.msk.bf16.mxu0 %vm5064_vm5, %v5063_v15 }
 0x364   :  { %4743 = vmatmul.mubr.msk.bf16.vlgmr.msra.gmra.mrb[76].mxu0 %vm1191_vm6, %v1817_v9  ;;  %v4987_v9 = vld [vmem:[%s6230_s6] sm:$0x1f]  }
 0x365   :  { %4746 = vmatprep.mubr.msk.bf16.mxu0 %vm5064_vm5, %v5063_v15  ;;  %4769 = vmatpush3.bf16.msra.mxu0 %v2061_v33  ;;  %v2129_v52 = vand.u32 %v4987_v9, %v5394_v36 }
 0x366   :  { %4796 = vmatprep.subr.bf16.mxu0 %v5063_v15 }
 0x367   :  { %4783 = vmatpush3.bf16.msra.mxu1 %v2129_v52 }
 0x368   :  { %4810 = vmatprep.subr.bf16.mxu1 %v5063_v15 }
 0x36c   :  { %4747 = vmatmul.mubr.msk.bf16.gmra.mrb[80].mxu0 %vm1191_vm6, %v1821_v26 }
 0x36d   :  { %4750 = vmatprep.mubr.msk.bf16.mxu0 %vm5064_vm5, %v5063_v15 }
 0x374   :  { %4751 = vmatmul.mubr.msk.bf16.gmra.mrb[84].mxu0 %vm1191_vm6, %v1825_v43 }
 0x375   :  { %4770 = vmatprep.mubr.msk.bf16.mxu0 %vm5064_vm5, %v5063_v15 }
 0x3a3   :  { %v5654_v59 = vpop.f32.mrb[44].mxu1 }
 0x3a4   :  { %v4730_v58 = vpop.f32.mrb[45].mxu1 }
 0x3a5   :  { %v5656_v60 = vpop.f32.mrb[46].mxu1 }
 0x3a6   :  { %v4731_v1 = vpop.f32.mrb[47].mxu1 }
 0x3a7   :  { %v1242_v2 = vpop.f32.mrb[4].mxu0 }
 0x3a8   :  { %v4646_v5 = vpop.f32.mrb[5].mxu0 }
 0x3a9   :  { %v1245_v8 = vpop.f32.mrb[6].mxu0 }
 0x3aa   :  { %v4647_v39 = vpop.f32.mrb[7].mxu0 }
 0x3ad   :  { %v5658_v10 = vpop.f32.mrb[48].mxu1 }
 0x3ae   :  { %v4734_v11 = vpop.f32.mrb[49].mxu1 }
 0x3af   :  { %v1250_v14 = vpop.f32.mrb[8].mxu0  ;;  %v5660_v17 = vpop.f32.mrb[50].mxu1 }
 0x3b0   :  { %v4650_v19 = vpop.f32.mrb[9].mxu0  ;;  %v4735_v25 = vpop.f32.mrb[51].mxu1 }
 0x3b1   :  { %v1253_v18 = vpop.f32.mrb[10].mxu0 }
 0x3b2   :  { %v4651_v27 = vpop.f32.mrb[11].mxu0 }
 0x3b5   :  { %v5662_v50 = vpop.f32.mrb[52].mxu1 }
 0x3b6   :  { %v4738_v28 = vpop.f32.mrb[53].mxu1 }
 0x3b7   :  { %v1258_v47 = vpop.f32.mrb[12].mxu0  ;;  %v5664_v29 = vpop.f32.mrb[54].mxu1 }
 0x3b8   :  { %v4654_v30 = vpop.f32.mrb[13].mxu0  ;;  %v4739_v31 = vpop.f32.mrb[55].mxu1 }
 0x3b9   :  { %v1261_v34 = vpop.f32.mrb[14].mxu0 }
 0x3ba   :  { %v4655_v46 = vpop.f32.mrb[15].mxu0 }
 0x3bd   :  { %v5666_v21 = vpop.f32.mrb[56].mxu1 }
 0x3be   :  { %v4758_v23 = vpop.f32.mrb[57].mxu1 }
 0x3bf   :  { %v1313_v20 = vpop.f32.mrb[16].mxu0  ;;  %v5668_v24 = vpop.f32.mrb[58].mxu1 }
 0x3c0   :  { %v1314_v37 = vadd.f32 %v1313_v20, %v1242_v2  ;;  %v4660_v41 = vpop.f32.mrb[17].mxu0  ;;  %v4759_v45 = vpop.f32.mrb[59].mxu1 }
 0x3c1   :  { %v1316_v61 = vpop.f32.mrb[18].mxu0 }
 0x3c2   :  { %v1317_v4 = vadd.f32 %v1316_v61, %v1245_v8  ;;  %v4661_v6 = vpop.f32.mrb[19].mxu0 }
 0x3c5   :  { %v5673_v32 = vpop.f32.mrb[60].mxu1 }
 0x3c6   :  { %v4762_v38 = vpop.f32.mrb[61].mxu1 }
 0x3c7   :  { %v1321_v40 = vpop.f32.mrb[20].mxu0  ;;  %v5676_v7 = vpop.f32.mrb[62].mxu1 }
 0x3c8   :  { %v1322_v42 = vadd.f32 %v1321_v40, %v1250_v14  ;;  %v4664_v48 = vpop.f32.mrb[21].mxu0  ;;  %v4763_v63 = vpop.f32.mrb[63].mxu1 }
 0x3c9   :  { %v1324_v62 = vpop.f32.mrb[22].mxu0 }
 0x3ca   :  { %v1325_v3 = vadd.f32 %v1324_v62, %v1253_v18  ;;  %v4665_v44 = vpop.f32.mrb[23].mxu0 }
 0x3cd   :  { %v5683_v26 = vpop.f32.mrb[64].mxu1 }
 0x3ce   :  { %v4766_v43 = vpop.f32.mrb[65].mxu1 }
 0x3cf   :  { %v1329_v54 = vpop.f32.mrb[24].mxu0  ;;  %v5685_v56 = vpop.f32.mrb[66].mxu1 }
 0x3d0   :  { %v1330_v55 = vadd.f32 %v1329_v54, %v1258_v47  ;;  %v4668_v51 = vpop.f32.mrb[25].mxu0  ;;  %v4767_v35 = vpop.f32.mrb[67].mxu1 }
 0x3d1   :  { %v1332_v13 = vpop.f32.mrb[26].mxu0 }
 0x3d2   :  { %v1333_v53 = vadd.f32 %v1332_v13, %v1261_v34  ;;  %v4669_v49 = vpop.f32.mrb[27].mxu0 }
 0x3d7   :  { %v1401_v57 = vpop.f32.mrb[28].mxu0 }
 0x3d8   :  { %v1424_v58 = vadd.f32 %v1401_v57, %v1314_v37  ;;  %v4674_v1 = vpop.f32.mrb[29].mxu0 }
 0x3d9   :  { %v1404_v2 = vpop.f32.mrb[30].mxu0 }
 0x3da   :  { %v1425_v5 = vadd.f32 %v1404_v2, %v1317_v4  ;;  %v4675_v8 = vpop.f32.mrb[31].mxu0 }
 0x3df   :  { %v1409_v39 = vpop.f32.mrb[32].mxu0 }
 0x3e0   :  { %v1426_v11 = vadd.f32 %v1409_v39, %v1322_v42  ;;  %v4678_v14 = vpop.f32.mrb[33].mxu0 }
 0x3e1   :  { %v1412_v19 = vpop.f32.mrb[34].mxu0 }
 0x3e2   :  { %v1427_v25 = vadd.f32 %v1412_v19, %v1325_v3  ;;  %v4679_v18 = vpop.f32.mrb[35].mxu0 }
 0x3e7   :  { %v1417_v27 = vpop.f32.mrb[36].mxu0 }
 0x3e8   :  { %v1428_v28 = vadd.f32 %v1417_v27, %v1330_v55  ;;  %v4682_v47 = vpop.f32.mrb[37].mxu0 }
 0x3e9   :  { %v1420_v30 = vpop.f32.mrb[38].mxu0 }
 0x3ea   :  { %v1429_v31 = vadd.f32 %v1420_v30, %v1333_v53  ;;  %v4683_v46 = vpop.f32.mrb[39].mxu0 }
 0x3ef   :  { %v1501_v34 = vpop.f32.mrb[40].mxu0 }
 0x3f0   :  { %v1524_v23 = vadd.f32 %v1501_v34, %v1424_v58  ;;  %v4688_v20 = vpop.f32.mrb[41].mxu0 }
 0x3f1   :  { %v1504_v37 = vpop.f32.mrb[42].mxu0 }
 0x3f2   :  { %v1525_v41 = vadd.f32 %v1504_v37, %v1425_v5  ;;  %v4689_v45 = vpop.f32.mrb[43].mxu0 }
 0x3f7   :  { %v1509_v61 = vpop.f32.mrb[44].mxu0 }
 0x3f8   :  { %v1526_v4 = vadd.f32 %v1509_v61, %v1426_v11  ;;  %v4692_v6 = vpop.f32.mrb[45].mxu0 }
 0x3f9   :  { %v1512_v22 = vpop.f32.mrb[46].mxu0 }
 0x3fa   :  { %v1527_v33 = vadd.f32 %v1512_v22, %v1427_v25  ;;  %v4693_v38 = vpop.f32.mrb[47].mxu0 }
 0x3ff   :  { %v1517_v40 = vpop.f32.mrb[48].mxu0 }
 0x400   :  { %v1528_v42 = vadd.f32 %v1517_v40, %v1428_v28  ;;  %v4696_v48 = vpop.f32.mrb[49].mxu0 }
 0x401   :  { %v1520_v63 = vpop.f32.mrb[50].mxu0  ;;  %v5697_v48 = vld [vmem:[%s6231_s5] ss:$0 sm:$0xff] }
 0x402   :  { %v1529_v62 = vadd.f32 %v1520_v63, %v1429_v31  ;;  %v4697_v3 = vpop.f32.mrb[51].mxu0 }
 0x407   :  { %v1591_v44 = vpop.f32.mrb[52].mxu0 }
 0x408   :  { %v1614_v9 = vadd.f32 %v1591_v44, %v1524_v23  ;;  %v4702_v52 = vpop.f32.mrb[53].mxu0 }
 0x409   :  { %v1594_v43 = vpop.f32.mrb[54].mxu0 }
 0x40a   :  { %v1615_v54 = vadd.f32 %v1594_v43, %v1525_v41  ;;  %v4703_v55 = vpop.f32.mrb[55].mxu0 }
 0x40f   :  { %v1599_v51 = vpop.f32.mrb[56].mxu0 }
 0x410   :  { %v1616_v35 = vadd.f32 %v1599_v51, %v1526_v4  ;;  %v4706_v13 = vpop.f32.mrb[57].mxu0 }
 0x411   :  { %v1602_v53 = vpop.f32.mrb[58].mxu0 }
 0x412   :  { %v1617_v49 = vadd.f32 %v1602_v53, %v1527_v33  ;;  %v4707_v57 = vpop.f32.mrb[59].mxu0 }
 0x417   :  { %v1607_v58 = vpop.f32.mrb[60].mxu0 }
 0x418   :  { %v1618_v1 = vadd.f32 %v1607_v58, %v1528_v42  ;;  %v4710_v2 = vpop.f32.mrb[61].mxu0 }
 0x419   :  { %v1610_v5 = vpop.f32.mrb[62].mxu0 }
 0x41a   :  { %v1619_v8 = vadd.f32 %v1610_v5, %v1529_v62  ;;  %v4711_v39 = vpop.f32.mrb[63].mxu0 }
 0x41f   :  { %v1689_v11 = vpop.f32.mrb[64].mxu0 }
 0x420   :  { %v1712_v14 = vadd.f32 %v1689_v11, %v1614_v9  ;;  %v4716_v19 = vpop.f32.mrb[65].mxu0 }
 0x421   :  { %v1692_v25 = vpop.f32.mrb[66].mxu0 }
 0x422   :  { %v1713_v18 = vadd.f32 %v1692_v25, %v1615_v54  ;;  %v4717_v27 = vpop.f32.mrb[67].mxu0  ;;  %v1802_v28 = vadd.f32 %v5654_v59, %v1712_v14 }
 0x424   :  { %v1803_v47 = vadd.f32 %v5656_v60, %v1713_v18 }
 0x427   :  { %v1697_v30 = vpop.f32.mrb[68].mxu0 }
 0x428   :  { %v1714_v31 = vadd.f32 %v1697_v30, %v1616_v35  ;;  %v4720_v46 = vpop.f32.mrb[69].mxu0 }
 0x429   :  { %v1700_v34 = vpop.f32.mrb[70].mxu0 }
 0x42a   :  { %v1715_v23 = vadd.f32 %v1700_v34, %v1617_v49  ;;  %v4721_v20 = vpop.f32.mrb[71].mxu0  ;;  %v1804_v37 = vadd.f32 %v5658_v10, %v1714_v31 }
 0x42c   :  { %v1805_v41 = vadd.f32 %v5660_v17, %v1715_v23 }
 0x42f   :  { %v1705_v45 = vpop.f32.mrb[72].mxu0 }
 0x430   :  { %v1716_v61 = vadd.f32 %v1705_v45, %v1618_v1  ;;  %v4724_v4 = vpop.f32.mrb[73].mxu0 }
 0x431   :  { %v1708_v6 = vpop.f32.mrb[74].mxu0 }
 0x432   :  { %v1717_v22 = vadd.f32 %v1708_v6, %v1619_v8  ;;  %v4725_v33 = vpop.f32.mrb[75].mxu0  ;;  %v1806_v59 = vadd.f32 %v5662_v50, %v1716_v61  ;;  %v4989_v50 = vld [vmem:[%s6230_s6 + $0x18] sm:$0x1f]  }
 0x433   :  { %v2299_v35 = vand.u32 %v4989_v50, %v5394_v36 }
 0x434   :  { %v1807_v60 = vadd.f32 %v5664_v29, %v1717_v22 }
 0x437   :  { %v1877_v38 = vpop.f32.mrb[76].mxu0 }
 0x438   :  { %v1900_v40 = vadd.f32 %v1877_v38, %v1802_v28  ;;  %v4744_v42 = vpop.f32.mrb[77].mxu0 }
 0x439   :  { %v1880_v10 = vpop.f32.mrb[78].mxu0 }
 0x43a   :  { %v1990_v17 = vadd.f32 %v5666_v21, %v1900_v40  ;;  %v1901_v63 = vadd.f32 %v1880_v10, %v1803_v47  ;;  %v4745_v62 = vpop.f32.mrb[79].mxu0  ;;  %v5709_v21 = vld [vmem:[%s6230_s6 + $0x10] sm:$0x1f]  }
 0x43b   :  { %v2211_v5 = vand.u32 %v5709_v21, %v5394_v36 }
 0x43c   :  { %v2003_v3 = vadd.f32 %v5697_v48, %v1990_v17  ;;  %v1991_v44 = vadd.f32 %v5668_v24, %v1901_v63 }
 0x43e   :  { %v2004_v29 = vadd.f32 %v5697_v48, %v1991_v44  ;;  %v2009_v52 = vmax.f32 %v2003_v3, 0.0 }
 0x43f   :  { %v1885_v9 = vpop.f32.mrb[80].mxu0 }
 0x440   :  { %v2010_v43 = vmax.f32 %v2004_v29, 0.0  ;;  %v1902_v54 = vadd.f32 %v1885_v9, %v1804_v37  ;;  %v4748_v55 = vpop.f32.mrb[81].mxu0 }
 0x441   :  { %v1888_v51 = vpop.f32.mrb[82].mxu0 }
 0x442   :  { %v5712_v24 = vpack.c.bf16 %v2010_v43, %v2009_v52  ;;  %v1992_v13 = vadd.f32 %v5673_v32, %v1902_v54  ;;  %v1903_v53 = vadd.f32 %v1888_v51, %v1805_v41  ;;  %v4749_v49 = vpop.f32.mrb[83].mxu0 }
 0x444   :  { %v2005_v57 = vadd.f32 %v5697_v48, %v1992_v13  ;;  %v1993_v58 = vadd.f32 %v5676_v7, %v1903_v53  ;;  %4785 = vmatmul.mubr.msk.bf16.vlgmr.msra.gmra.mrb[68].mxu1 %vm1191_vm6, %v5712_v24  ;;  %v2024_v1 = vshrl.u32 %v5712_v24, 16  ;;  %v2026_v2 = vshll.u32 %v5712_v24, 16 }
 0x445   :  { %4788 = vmatprep.mubr.msk.bf16.mxu1 %vm5064_vm5, %v5063_v15  ;;  %4811 = vmatpush3.bf16.msra.mxu1 %v2299_v35  ;;  %v2191_v32 = vrot.slane %v5712_v24, 1  ;;  %v2361_v11 = vrot.slane %v5712_v24, 2  ;;  %v2531_v23 = vrot.slane %v5712_v24, 3  ;;  %v2701_v41 = vrot.slane %v5712_v24, 4 }
 0x446   :  { %v2006_v8 = vadd.f32 %v5697_v48, %v1993_v58  ;;  %v2028_v39 = vrot.slane %v2026_v2, 1  ;;  %v2273_v7 = vrot.slane %v2024_v1, 1  ;;  %4838 = vmatprep.subr.bf16.mxu1 %v5063_v15  ;;  %v2274_v19 = vrot.slane %v2026_v2, 2 }
 0x447   :  { %v1893_v14 = vpop.f32.mrb[84].mxu0  ;;  %v2443_v25 = vrot.slane %v2024_v1, 2  ;;  %v2444_v18 = vrot.slane %v2026_v2, 3  ;;  %v2613_v27 = vrot.slane %v2024_v1, 3  ;;  %v2011_v28 = vmax.f32 %v2005_v57, 0.0 }
 0x448   :  { %v2012_v47 = vmax.f32 %v2006_v8, 0.0  ;;  %v1904_v30 = vadd.f32 %v1893_v14, %v1806_v59  ;;  %v4752_v31 = vpop.f32.mrb[85].mxu0  ;;  %v2614_v46 = vrot.slane %v2026_v2, 4  ;;  %v2784_v20 = vrot.slane %v2024_v1, 4 }
 0x449   :  { %v1896_v34 = vpop.f32.mrb[86].mxu0  ;;  %v2785_v37 = vrot.slane %v2026_v2, 5  ;;  %v2029_v22 = vor.u32 %v2028_v39, %v2024_v1  ;;  %v2275_v33 = vor.u32 %v2274_v19, %v2273_v7  ;;  %v2445_v38 = vor.u32 %v2444_v18, %v2443_v25  ;;  %v4991_v19 = vld [vmem:[%s6230_s6 + $0x28] sm:$0x1f]  }
 0x44a   :  { %v5731_v45 = vpack.c.bf16 %v2012_v47, %v2011_v28  ;;  %v1994_v61 = vadd.f32 %v5683_v26, %v1904_v30  ;;  %v1905_v4 = vadd.f32 %v1896_v34, %v1807_v60  ;;  %v4753_v6 = vpop.f32.mrb[87].mxu0  ;;  %v2615_v40 = vor.u32 %v2614_v46, %v2613_v27 }
 0x44b   :  { %v5734_v59 = vor.u32 %v2785_v37, %v2784_v20  ;;  %v2469_v6 = vand.u32 %v4991_v19, %v5394_v36 }
 0x44c   :  { %v2007_v42 = vadd.f32 %v5697_v48, %v1994_v61  ;;  %v1995_v10 = vadd.f32 %v5685_v56, %v1905_v4  ;;  %4789 = vmatmul.mubr.msk.bf16.gmra.mrb[72].mxu1 %vm1191_vm6, %v5731_v45  ;;  %v2031_v17 = vshll.u32 %v5731_v45, 16  ;;  %v2035_v63 = vshrl.u32 %v5731_v45, 16 }
 0x44d   :  { %4792 = vmatprep.mubr.msk.bf16.mxu1 %vm5064_vm5, %v5063_v15  ;;  %v2192_v26 = vrot.slane %v5731_v45, 1  ;;  %v2362_v60 = vrot.slane %v5731_v45, 2  ;;  %v2532_v62 = vrot.slane %v5731_v45, 3  ;;  %v2702_v3 = vrot.slane %v5731_v45, 4 }
 0x44e   :  { %v2013_v44 = vmax.f32 %v2007_v42, 0.0  ;;  %v2008_v56 = vadd.f32 %v5697_v48, %v1995_v10  ;;  %v2033_v50 = vrot.slane %v2031_v17, 1  ;;  %v2276_v29 = vrot.slane %v2035_v63, 1 }
 0x44f   :  { %v2277_v9 = vrot.slane %v2031_v17, 2  ;;  %v5750_v52 = vsel %vm407_vm11, %v2191_v32, %v2192_v26  ;;  %v2446_v43 = vrot.slane %v2035_v63, 2  ;;  %v2447_v54 = vrot.slane %v2031_v17, 3 }
 0x450   :  { %v2014_v55 = vmax.f32 %v2008_v56, 0.0  ;;  %v2034_v51 = vsel %vm207_vm13, %v2029_v22, %v2033_v50  ;;  %v2037_v21 = vor.u32 %v2035_v63, %v2033_v50  ;;  %v5754_v35 = vsel %vm615_vm12, %v2361_v11, %v2362_v60 }
 0x451   :  { %4771 = vmatmul.mubr.msk.bf16.vlgmr.msra.gmra.mrb[88].mxu0 %vm1191_vm6, %v2034_v51  ;;  %v2278_v13 = vor.u32 %v2277_v9, %v2276_v29  ;;  %v2448_v48 = vor.u32 %v2447_v54, %v2446_v43  ;;  %v2616_v53 = vrot.slane %v2035_v63, 3  ;;  %v2617_v49 = vrot.slane %v2031_v17, 4  ;;  %v4990_v9 = vld [vmem:[%s6230_s6 + $0x20] sm:$0x1f]   ;;  %v4993_v54 = vld [vmem:[%s6230_s6 + $0x38] sm:$0x1f]  }
 0x452   :  { %v5757_v57 = vpack.c.bf16 %v2014_v55, %v2013_v44  ;;  %4797 = vmatpush3.bf16.msra.mxu0 %v2211_v5  ;;  %4774 = vmatprep.mubr.msk.bf16.mxu0 %vm5064_vm5, %v5063_v15  ;;  %v5762_v58 = vsel %vm823_vm2, %v2531_v23, %v2532_v62  ;;  %v2787_v1 = vrot.slane %v2035_v63, 4  ;;  %v2788_v2 = vrot.slane %v2031_v17, 5 }
 0x453   :  { %v2279_v32 = vsel %vm507_vm15, %v2275_v33, %v2278_v13  ;;  %4824 = vmatprep.subr.bf16.mxu0 %v5063_v15  ;;  %v5767_v8 = vsel %vm715_vm0, %v2445_v38, %v2448_v48  ;;  %v2618_v39 = vor.u32 %v2617_v49, %v2616_v53  ;;  %v5772_v5 = vsel %vm1031_vm3, %v2701_v41, %v2702_v3  ;;  %v4996_v53 = vld [vmem:[%s6230_s6 + $0x50] sm:$0x1f]  }
 0x454   :  { %4793 = vmatmul.mubr.msk.bf16.gmra.mrb[76].mxu1 %vm1191_vm6, %v5757_v57  ;;  %v2039_v7 = vshll.u32 %v5757_v57, 16  ;;  %v2043_v11 = vshrl.u32 %v5757_v57, 16  ;;  %v2194_v14 = vrot.slane %v5757_v57, 1  ;;  %v2364_v25 = vrot.slane %v5757_v57, 2 }
 0x455   :  { %4812 = vmatprep.mubr.msk.bf16.mxu1 %vm5064_vm5, %v5063_v15  ;;  %v5786_v18 = vsel %vm923_vm4, %v2615_v40, %v2618_v39  ;;  %v2534_v27 = vrot.slane %v5757_v57, 3  ;;  %v2789_v28 = vor.u32 %v2788_v2, %v2787_v1  ;;  %v2704_v47 = vrot.slane %v5757_v57, 4 }
 0x456   :  { %v2041_v30 = vrot.slane %v2039_v7, 1  ;;  %v2280_v31 = vrot.slane %v2043_v11, 1  ;;  %v2281_v46 = vrot.slane %v2039_v7, 2  ;;  %v2195_v34 = vsel %vm407_vm11, %v2192_v26, %v2194_v14  ;;  %vm6207_vm11 = vmand %vm3765_vm1, %vm3766_vm10 }
 0x457   :  { %v2450_v23 = vrot.slane %v2043_v11, 2  ;;  %v2451_v20 = vrot.slane %v2039_v7, 3  ;;  %v5796_v37 = vsel %vm615_vm12, %v2362_v60, %v2364_v25  ;;  %v2620_v41 = vrot.slane %v2043_v11, 3 }
 0x458   :  { %v2042_v61 = vsel %vm207_vm13, %v2037_v21, %v2041_v30  ;;  %v2282_v4 = vor.u32 %v2281_v46, %v2280_v31  ;;  %v2621_v22 = vrot.slane %v2039_v7, 4  ;;  %v5804_v38 = vsel %vm823_vm2, %v2532_v62, %v2534_v27  ;;  %v4995_v21 = vld [vmem:[%s6230_s6 + $0x48] sm:$0x1f]  }
 0x459   :  { %4775 = vmatmul.mubr.msk.bf16.gmra.mrb[92].mxu0 %vm1191_vm6, %v2042_v61  ;;  %v2452_v33 = vor.u32 %v2451_v20, %v2450_v23  ;;  %v5808_v40 = vsel %vm2783_vm7, %v5734_v59, %v2789_v28  ;;  %v2791_v42 = vrot.slane %v2043_v11, 4  ;;  %v2792_v63 = vrot.slane %v2039_v7, 5 }
 0x45a   :  { %4778 = vmatprep.mubr.msk.bf16.mxu0 %vm5064_vm5, %v5063_v15  ;;  %v2283_v10 = vsel %vm507_vm15, %v2278_v13, %v2282_v4  ;;  %v5813_v17 = vor.u32 %v2621_v22, %v2620_v41  ;;  %v5820_v26 = vsel %vm1031_vm3, %v2702_v3, %v2704_v47  ;;  %v2873_v59 = vrot.slane %v5712_v24, 5  ;;  %v4994_v13 = vld [vmem:[%s6230_s6 + $0x40] sm:$0x1f]  }
 0x45b   :  { %v2453_v60 = vsel %vm715_vm0, %v2448_v48, %v2452_v33  ;;  %v2874_v62 = vrot.slane %v5731_v45, 5  ;;  %v2876_v44 = vrot.slane %v5757_v57, 5  ;;  %v5829_v50 = vor.u32 %v2792_v63, %v2791_v42  ;;  %v4997_v57 = vld [vmem:[%s6232_s8 + $0x24] ss:$16 sps:$4 sm:$0x1f]  }
 0x45c   :  { %4813 = vmatmul.mubr.msk.bf16.vlgmr.msra.gmra.mrb[80].mxu1 %vm1191_vm6, %v2279_v32  ;;  %v2623_v56 = vsel %vm923_vm4, %v2618_v39, %v5813_v17  ;;  %v2045_v29 = vor.u32 %v2043_v11, %v2041_v30  ;;  %v2381_v43 = vand.u32 %v4990_v9, %v5394_v36  ;;  %v2639_v55 = vand.u32 %v4993_v54, %v5394_v36  ;;  %v5002_v42 = vld [vmem:[%s6232_s8 + $0x8] ss:$16 sps:$4 sm:$0x1f]  }
 0x45d   :  { %4816 = vmatprep.mubr.msk.bf16.mxu1 %vm5064_vm5, %v5063_v15  ;;  %4839 = vmatpush3.bf16.msra.mxu1 %v2469_v6  ;;  %v5834_v3 = vsel %vm2872_vm8, %v2873_v59, %v2874_v62  ;;  %v5839_v24 = vsel %vm2872_vm8, %v2874_v62, %v2876_v44  ;;  %v2794_v45 = vsel %vm2783_vm7, %v2789_v28, %v5829_v50  ;;  %v4999_v28 = vld [vmem:[%s6232_s8 + $0x20] ss:$16 sps:$4 sm:$0x1f]   ;;  %v5005_v62 = vld [vmem:[%s6232_s8 + $0x2c] ss:$16 sps:$4 sm:$0x1f]  }
 0x45e   :  { %4866 = vmatprep.subr.bf16.mxu1 %v5063_v15  ;;  %v2721_v48 = vand.u32 %v4994_v13, %v5394_v36  ;;  %v2893_v49 = vand.u32 %v4996_v53, %v5394_v36  ;;  %v3009_v31 = vsel %vm823_vm2, %v4999_v28, 0  ;;  %vm3999_vm12 = vcmask 416768  }
 0x45f   :  { %vm4089_vm1 = vcmask 123904  }
 0x461   :  { %4779 = vmatmul.mubr.msk.bf16.gmra.mrb[96].mxu0 %vm1191_vm6, %v2045_v29 }
 0x462   :  { %4798 = vmatprep.mubr.msk.bf16.mxu0 %vm5064_vm5, %v5063_v15 }
 0x464   :  { %4817 = vmatmul.mubr.msk.bf16.gmra.mrb[84].mxu1 %vm1191_vm6, %v2283_v10 }
 0x465   :  { %4820 = vmatprep.mubr.msk.bf16.mxu1 %vm5064_vm5, %v5063_v15 }
 0x469   :  { %4799 = vmatmul.mubr.msk.bf16.vlgmr.msra.gmra.mrb[100].mxu0 %vm1191_vm6, %v5750_v52  ;;  %v4992_v52 = vld [vmem:[%s6230_s6 + $0x30] sm:$0x1f]  }
 0x46a   :  { %4825 = vmatpush3.bf16.msra.mxu0 %v2381_v43  ;;  %4802 = vmatprep.mubr.msk.bf16.mxu0 %vm5064_vm5, %v5063_v15  ;;  %v2551_v51 = vand.u32 %v4992_v52, %v5394_v36 }
 0x46b   :  { %4852 = vmatprep.subr.bf16.mxu0 %v5063_v15 }
 0x46c   :  { %4821 = vmatmul.mubr.msk.bf16.gmra.mrb[88].mxu1 %vm1191_vm6, %v2282_v4 }
 0x46d   :  { %4840 = vmatprep.mubr.msk.bf16.mxu1 %vm5064_vm5, %v5063_v15 }
 0x471   :  { %4803 = vmatmul.mubr.msk.bf16.gmra.mrb[104].mxu0 %vm1191_vm6, %v2195_v34 }
 0x472   :  { %4806 = vmatprep.mubr.msk.bf16.mxu0 %vm5064_vm5, %v5063_v15 }
 0x474   :  { %4841 = vmatmul.mubr.msk.bf16.vlgmr.msra.gmra.mrb[92].mxu1 %vm1191_vm6, %v5767_v8 }
 0x475   :  { %4844 = vmatprep.mubr.msk.bf16.mxu1 %vm5064_vm5, %v5063_v15  ;;  %4867 = vmatpush3.bf16.msra.mxu1 %v2639_v55 }
 0x476   :  { %4894 = vmatprep.subr.bf16.mxu1 %v5063_v15 }
 0x479   :  { %4807 = vmatmul.mubr.msk.bf16.gmra.mrb[108].mxu0 %vm1191_vm6, %v2194_v14 }
 0x47a   :  { %4826 = vmatprep.mubr.msk.bf16.mxu0 %vm5064_vm5, %v5063_v15 }
 0x47c   :  { %4845 = vmatmul.mubr.msk.bf16.gmra.mrb[96].mxu1 %vm1191_vm6, %v2453_v60  ;;  %v5003_v60 = vld [vmem:[%s6232_s8 + $0x4c] ss:$16 sps:$4 sm:$0x1f]  }
 0x47d   :  { %4848 = vmatprep.mubr.msk.bf16.mxu1 %vm5064_vm5, %v5063_v15 }
 0x481   :  { %4827 = vmatmul.mubr.msk.bf16.vlgmr.msra.gmra.mrb[112].mxu0 %vm1191_vm6, %v5754_v35  ;;  %v2810_v35 = vand.u32 %v4995_v21, %v5394_v36 }
 0x482   :  { %4853 = vmatpush3.bf16.msra.mxu0 %v2551_v51  ;;  %4830 = vmatprep.mubr.msk.bf16.mxu0 %vm5064_vm5, %v5063_v15 }
 0x483   :  { %4880 = vmatprep.subr.bf16.mxu0 %v5063_v15 }
 0x484   :  { %4849 = vmatmul.mubr.msk.bf16.gmra.mrb[100].mxu1 %vm1191_vm6, %v2452_v33 }
 0x485   :  { %4868 = vmatprep.mubr.msk.bf16.mxu1 %vm5064_vm5, %v5063_v15 }
 0x489   :  { %4831 = vmatmul.mubr.msk.bf16.gmra.mrb[116].mxu0 %vm1191_vm6, %v5796_v37 }
 0x48a   :  { %4834 = vmatprep.mubr.msk.bf16.mxu0 %vm5064_vm5, %v5063_v15 }
 0x48c   :  { %4869 = vmatmul.mubr.msk.bf16.vlgmr.msra.gmra.mrb[104].mxu1 %vm1191_vm6, %v5786_v18 }
 0x48d   :  { %4872 = vmatprep.mubr.msk.bf16.mxu1 %vm5064_vm5, %v5063_v15  ;;  %4895 = vmatpush3.bf16.msra.mxu1 %v2810_v35 }
 0x48e   :  { %4297 = vmatprep.subr.msk.bf16.mxu1 %vm823_vm2, %v4997_v57 }
 0x491   :  { %4835 = vmatmul.mubr.msk.bf16.gmra.mrb[120].mxu0 %vm1191_vm6, %v2364_v25 }
 0x492   :  { %4854 = vmatprep.mubr.msk.bf16.mxu0 %vm5064_vm5, %v5063_v15 }
 0x494   :  { %4873 = vmatmul.mubr.msk.bf16.gmra.mrb[108].mxu1 %vm1191_vm6, %v2623_v56 }
 0x495   :  { %4876 = vmatprep.mubr.msk.bf16.mxu1 %vm5064_vm5, %v5063_v15 }
 0x499   :  { %4855 = vmatmul.mubr.msk.bf16.vlgmr.msra.gmra.mrb[124].mxu0 %vm1191_vm6, %v5762_v58 }
 0x49a   :  { %4881 = vmatpush3.bf16.msra.mxu0 %v2721_v48  ;;  %4858 = vmatprep.mubr.msk.bf16.mxu0 %vm5064_vm5, %v5063_v15 }
 0x49b   :  { %4908 = vmatprep.subr.bf16.mxu0 %v5063_v15 }
 0x49c   :  { %4877 = vmatmul.mubr.msk.bf16.gmra.mrb[112].mxu1 %vm1191_vm6, %v5813_v17 }
 0x49d   :  { %4896 = vmatprep.mubr.msk.bf16.mxu1 %vm5064_vm5, %v5063_v15 }
 0x4a1   :  { %4859 = vmatmul.mubr.msk.bf16.gmra.mrb[128].mxu0 %vm1191_vm6, %v5804_v38  ;;  %v5000_v38 = vld [vmem:[%s6232_s8 + $0xc] ss:$16 sps:$4 sm:$0x1f]  }
 0x4a2   :  { %4862 = vmatprep.mubr.msk.bf16.mxu0 %vm5064_vm5, %v5063_v15 }
 0x4a4   :  { %4897 = vmatmul.mubr.msk.bf16.vlgmr.msra.gmra.mrb[116].mxu1 %vm1191_vm6, %v5808_v40 }
 0x4a5   :  { %4900 = vmatprep.mubr.msk.bf16.mxu1 %vm5064_vm5, %v5063_v15  ;;  %3021 = vmatpush1.bf16.msra.mxu1 %v3009_v31 }
 0x4a6   :  { %4299 = vmatprep.subr.msk.bf16.mxu1 %vm823_vm2, %v5005_v62 }
 0x4a9   :  { %4863 = vmatmul.mubr.msk.bf16.gmra.mrb[132].mxu0 %vm1191_vm6, %v2534_v27 }
 0x4aa   :  { %4882 = vmatprep.mubr.msk.bf16.mxu0 %vm5064_vm5, %v5063_v15 }
 0x4ac   :  { %4901 = vmatmul.mubr.msk.bf16.gmra.mrb[120].mxu1 %vm1191_vm6, %v2794_v45 }
 0x4ad   :  { %4904 = vmatprep.mubr.msk.bf16.mxu1 %vm5064_vm5, %v5063_v15 }
 0x4b1   :  { %4883 = vmatmul.mubr.msk.bf16.vlgmr.msra.gmra.mrb[136].mxu0 %vm1191_vm6, %v5772_v5 }
 0x4b2   :  { %4909 = vmatpush3.bf16.msra.mxu0 %v2893_v49  ;;  %4886 = vmatprep.mubr.msk.bf16.mxu0 %vm5064_vm5, %v5063_v15 }
 0x4b3   :  { %4307 = vmatprep.subr.msk.bf16.mxu0 %vm823_vm2, %v5000_v38 }
 0x4b4   :  { %4905 = vmatmul.mubr.msk.bf16.gmra.mrb[124].mxu1 %vm1191_vm6, %v5829_v50 }
 0x4b5   :  { %3052 = vmatprep.mubr.bf16.mxu1 %v5061_v0 }
 0x4b9   :  { %4887 = vmatmul.mubr.msk.bf16.gmra.mrb[140].mxu0 %vm1191_vm6, %v5820_v26  ;;  %v3127_v26 = vsel %vm823_vm2, %v5002_v42, 0 }
 0x4ba   :  { %4890 = vmatprep.mubr.msk.bf16.mxu0 %vm5064_vm5, %v5063_v15 }
 0x4c1   :  { %4891 = vmatmul.mubr.msk.bf16.gmra.mrb[144].mxu0 %vm1191_vm6, %v2704_v47 }
 0x4c2   :  { %4910 = vmatprep.mubr.msk.bf16.mxu0 %vm5064_vm5, %v5063_v15 }
 0x4c9   :  { %4911 = vmatmul.mubr.msk.bf16.vlgmr.msra.gmra.mrb[148].mxu0 %vm1191_vm6, %v5834_v3 }
 0x4ca   :  { %4914 = vmatprep.mubr.msk.bf16.mxu0 %vm5064_vm5, %v5063_v15  ;;  %3174 = vmatpush1.bf16.msra.mxu0 %v3127_v26 }
 0x4cb   :  { %4319 = vmatprep.subr.msk.bf16.mxu0 %vm823_vm2, %v5003_v60 }
 0x4d1   :  { %4915 = vmatmul.mubr.msk.bf16.gmra.mrb[152].mxu0 %vm1191_vm6, %v5839_v24 }
 0x4d2   :  { %4918 = vmatprep.mubr.msk.bf16.mxu0 %vm5064_vm5, %v5063_v15 }
 0x4d9   :  { %4919 = vmatmul.mubr.msk.bf16.gmra.mrb[156].mxu0 %vm1191_vm6, %v2876_v44 }
 0x4da   :  { %3205 = vmatprep.mubr.bf16.mxu0 %v5061_v0 }
 0x517   :  { %v2165_v36 = vpop.f32.mrb[68].mxu1 }
 0x518   :  { %v4786_v58 = vpop.f32.mrb[69].mxu1 }
 0x519   :  { %v2168_v1 = vpop.f32.mrb[70].mxu1 }
 0x51a   :  { %v4787_v2 = vpop.f32.mrb[71].mxu1 }
 0x51f   :  { %v2173_v32 = vpop.f32.mrb[72].mxu1 }
 0x520   :  { %v4790_v8 = vpop.f32.mrb[73].mxu1 }
 0x521   :  { %v2175_v39 = vpop.f32.mrb[74].mxu1 }
 0x522   :  { %v4791_v5 = vpop.f32.mrb[75].mxu1 }
 0x524   :  { %v2097_v7 = vpop.f32.mrb[88].mxu0 }
 0x525   :  { %v2166_v11 = vadd.f32 %v2165_v36, %v2097_v7  ;;  %v4772_v14 = vpop.f32.mrb[89].mxu0 }
 0x526   :  { %v2100_v19 = vpop.f32.mrb[90].mxu0 }
 0x527   :  { %v2169_v25 = vadd.f32 %v2168_v1, %v2100_v19  ;;  %v4773_v15 = vpop.f32.mrb[91].mxu0  ;;  %v2179_v18 = vpop.f32.mrb[76].mxu1 }
 0x528   :  { %v4794_v27 = vpop.f32.mrb[77].mxu1 }
 0x529   :  { %v2182_v47 = vpop.f32.mrb[78].mxu1 }
 0x52a   :  { %v4795_v30 = vpop.f32.mrb[79].mxu1 }
 0x52c   :  { %v2105_v46 = vpop.f32.mrb[92].mxu0 }
 0x52d   :  { %v4776_v34 = vpop.f32.mrb[93].mxu0 }
 0x52e   :  { %v2107_v23 = vpop.f32.mrb[94].mxu0 }
 0x52f   :  { %v4777_v20 = vpop.f32.mrb[95].mxu0  ;;  %v2335_v37 = vpop.f32.mrb[80].mxu1 }
 0x530   :  { %v4814_v41 = vpop.f32.mrb[81].mxu1 }
 0x531   :  { %v2338_v61 = vpop.f32.mrb[82].mxu1 }
 0x532   :  { %v4815_v4 = vpop.f32.mrb[83].mxu1 }
 0x534   :  { %v2111_v6 = vpop.f32.mrb[96].mxu0 }
 0x535   :  { %v2180_v22 = vadd.f32 %v2179_v18, %v2111_v6  ;;  %v4780_v33 = vpop.f32.mrb[97].mxu0 }
 0x536   :  { %v2114_v40 = vpop.f32.mrb[98].mxu0 }
 0x537   :  { %v4781_v10 = vpop.f32.mrb[99].mxu0  ;;  %v2343_v17 = vpop.f32.mrb[84].mxu1 }
 0x538   :  { %v4818_v63 = vpop.f32.mrb[85].mxu1 }
 0x539   :  { %v2345_v59 = vpop.f32.mrb[86].mxu1 }
 0x53a   :  { %v4819_v44 = vpop.f32.mrb[87].mxu1 }
 0x53c   :  { %v2247_v56 = vpop.f32.mrb[100].mxu0 }
 0x53d   :  { %v2267_v50 = vadd.f32 %v2247_v56, %v2166_v11  ;;  %v4800_v3 = vpop.f32.mrb[101].mxu0 }
 0x53e   :  { %v2250_v24 = vpop.f32.mrb[102].mxu0 }
 0x53f   :  { %v2268_v45 = vadd.f32 %v2250_v24, %v2169_v25  ;;  %v4801_v29 = vpop.f32.mrb[103].mxu0  ;;  %v2349_v9 = vpop.f32.mrb[88].mxu1  ;;  %v2355_v43 = vadd.f32 %v2335_v37, %v2267_v50 }
 0x540   :  { %v4822_v54 = vpop.f32.mrb[89].mxu1 }
 0x541   :  { %v2352_v55 = vpop.f32.mrb[90].mxu1  ;;  %v2356_v52 = vadd.f32 %v2338_v61, %v2268_v45 }
 0x542   :  { %v4823_v51 = vpop.f32.mrb[91].mxu1 }
 0x544   :  { %v2255_v21 = vpop.f32.mrb[104].mxu0 }
 0x545   :  { %v4804_v35 = vpop.f32.mrb[105].mxu0 }
 0x546   :  { %v2257_v13 = vpop.f32.mrb[106].mxu0 }
 0x547   :  { %v4805_v48 = vpop.f32.mrb[107].mxu0  ;;  %v2505_v53 = vpop.f32.mrb[92].mxu1 }
 0x548   :  { %v4842_v49 = vpop.f32.mrb[93].mxu1 }
 0x549   :  { %v2508_v36 = vpop.f32.mrb[94].mxu1 }
 0x54a   :  { %v4843_v58 = vpop.f32.mrb[95].mxu1 }
 0x54c   :  { %v2261_v1 = vpop.f32.mrb[108].mxu0 }
 0x54d   :  { %v2269_v2 = vadd.f32 %v2261_v1, %v2180_v22  ;;  %v4808_v32 = vpop.f32.mrb[109].mxu0 }
 0x54e   :  { %v2264_v8 = vpop.f32.mrb[110].mxu0 }
 0x54f   :  { %v4809_v39 = vpop.f32.mrb[111].mxu0  ;;  %v2513_v5 = vpop.f32.mrb[96].mxu1  ;;  %v2357_v7 = vadd.f32 %v2349_v9, %v2269_v2 }
 0x550   :  { %v4846_v11 = vpop.f32.mrb[97].mxu1 }
 0x551   :  { %v2515_v14 = vpop.f32.mrb[98].mxu1 }
 0x552   :  { %v4847_v19 = vpop.f32.mrb[99].mxu1 }
 0x554   :  { %v2417_v25 = vpop.f32.mrb[112].mxu0 }
 0x555   :  { %v2437_v15 = vadd.f32 %v2417_v25, %v2355_v43  ;;  %v4828_v18 = vpop.f32.mrb[113].mxu0 }
 0x556   :  { %v2420_v57 = vpop.f32.mrb[114].mxu0 }
 0x557   :  { %v2438_v27 = vadd.f32 %v2420_v57, %v2356_v52  ;;  %v4829_v28 = vpop.f32.mrb[115].mxu0  ;;  %v2519_v47 = vpop.f32.mrb[100].mxu1  ;;  %v2525_v30 = vadd.f32 %v2505_v53, %v2437_v15 }
 0x558   :  { %v4850_v31 = vpop.f32.mrb[101].mxu1 }
 0x559   :  { %v2522_v46 = vpop.f32.mrb[102].mxu1  ;;  %v2526_v34 = vadd.f32 %v2508_v36, %v2438_v27 }
 0x55a   :  { %v4851_v23 = vpop.f32.mrb[103].mxu1 }
 0x55c   :  { %v2425_v20 = vpop.f32.mrb[116].mxu0 }
 0x55d   :  { %v4832_v37 = vpop.f32.mrb[117].mxu0 }
 0x55e   :  { %v2427_v41 = vpop.f32.mrb[118].mxu0 }
 0x55f   :  { %v4833_v61 = vpop.f32.mrb[119].mxu0  ;;  %v2675_v4 = vpop.f32.mrb[104].mxu1 }
 0x560   :  { %v4870_v6 = vpop.f32.mrb[105].mxu1 }
 0x561   :  { %v2678_v22 = vpop.f32.mrb[106].mxu1 }
 0x562   :  { %v4871_v33 = vpop.f32.mrb[107].mxu1 }
 0x564   :  { %v2431_v38 = vpop.f32.mrb[120].mxu0 }
 0x565   :  { %v2439_v40 = vadd.f32 %v2431_v38, %v2357_v7  ;;  %v4836_v42 = vpop.f32.mrb[121].mxu0 }
 0x566   :  { %v2434_v10 = vpop.f32.mrb[122].mxu0  ;;  %v4288_v42 = vld [vmem:[%s6233_s7] ss:$0 sm:$0xff] }
 0x567   :  { %v4837_v17 = vpop.f32.mrb[123].mxu0  ;;  %v2683_v63 = vpop.f32.mrb[108].mxu1  ;;  %v2527_v26 = vadd.f32 %v2519_v47, %v2439_v40 }
 0x568   :  { %v4874_v60 = vpop.f32.mrb[109].mxu1 }
 0x569   :  { %v2685_v59 = vpop.f32.mrb[110].mxu1 }
 0x56a   :  { %v4875_v62 = vpop.f32.mrb[111].mxu1 }
 0x56c   :  { %v2587_v44 = vpop.f32.mrb[124].mxu0 }
 0x56d   :  { %v2607_v56 = vadd.f32 %v2587_v44, %v2525_v30  ;;  %v4856_v50 = vpop.f32.mrb[125].mxu0 }
 0x56e   :  { %v2590_v3 = vpop.f32.mrb[126].mxu0 }
 0x56f   :  { %v2608_v24 = vadd.f32 %v2590_v3, %v2526_v34  ;;  %v4857_v45 = vpop.f32.mrb[127].mxu0  ;;  %v2689_v29 = vpop.f32.mrb[112].mxu1  ;;  %v2695_v9 = vadd.f32 %v2675_v4, %v2607_v56 }
 0x570   :  { %v4878_v43 = vpop.f32.mrb[113].mxu1 }
 0x571   :  { %v2692_v54 = vpop.f32.mrb[114].mxu1  ;;  %v2696_v55 = vadd.f32 %v2678_v22, %v2608_v24 }
 0x572   :  { %v4879_v52 = vpop.f32.mrb[115].mxu1 }
 0x574   :  { %v2595_v51 = vpop.f32.mrb[128].mxu0 }
 0x575   :  { %v4860_v21 = vpop.f32.mrb[129].mxu0 }
 0x576   :  { %v2597_v35 = vpop.f32.mrb[130].mxu0 }
 0x577   :  { %v4861_v13 = vpop.f32.mrb[131].mxu0  ;;  %v2846_v48 = vpop.f32.mrb[116].mxu1  ;;  %v5007_v35 = vld [vmem:[%s6232_s8 + $0x48] ss:$16 sps:$4 sm:$0x1f]  }
 0x578   :  { %v4898_v53 = vpop.f32.mrb[117].mxu1 }
 0x579   :  { %v2849_v49 = vpop.f32.mrb[118].mxu1  ;;  %v3247_v53 = vsel %vm823_vm2, %v5007_v35, 0  ;;  %v5051_v35 = vld [vmem:[%s6234_s10 + $0x58] sm:$0xff]  }
 0x57a   :  { %v4899_v36 = vpop.f32.mrb[119].mxu1 }
 0x57c   :  { %v2601_v58 = vpop.f32.mrb[132].mxu0 }
 0x57d   :  { %v2609_v1 = vadd.f32 %v2601_v58, %v2527_v26  ;;  %v4864_v2 = vpop.f32.mrb[133].mxu0 }
 0x57e   :  { %v2604_v32 = vpop.f32.mrb[134].mxu0 }
 0x57f   :  { %v4865_v8 = vpop.f32.mrb[135].mxu0  ;;  %v2854_v39 = vpop.f32.mrb[120].mxu1  ;;  %v2697_v5 = vadd.f32 %v2689_v29, %v2609_v1  ;;  %v5008_v1 = vld [vmem:[%s6232_s8 + $0x28] ss:$16 sps:$4 sm:$0x1f]  }
 0x580   :  { %v4902_v7 = vpop.f32.mrb[121].mxu1  ;;  %v5013_v8 = vld [vmem:[%s6232_s8 + $0x68] ss:$16 sps:$4 sm:$0x1f]  }
 0x581   :  { %v2856_v11 = vpop.f32.mrb[122].mxu1  ;;  %v5011_v7 = vld [vmem:[%s6232_s8 + $0x4] ss:$16 sps:$4 sm:$0x1f]  }
 0x582   :  { %v4903_v14 = vpop.f32.mrb[123].mxu1 }
 0x583   :  { %v3372_v14 = vsel %vm823_vm2, %v5013_v8, 0 }
 0x584   :  { %v2757_v19 = vpop.f32.mrb[136].mxu0 }
 0x585   :  { %v2777_v25 = vadd.f32 %v2757_v19, %v2695_v9  ;;  %v4884_v15 = vpop.f32.mrb[137].mxu0  ;;  %v5015_v19 = vld [vmem:[%s6232_s8 + $0x8c] ss:$16 sps:$4 sm:$0x1f]  }
 0x586   :  { %v2760_v18 = vpop.f32.mrb[138].mxu0 }
 0x587   :  { %v2778_v57 = vadd.f32 %v2760_v18, %v2696_v55  ;;  %v4885_v27 = vpop.f32.mrb[139].mxu0  ;;  %v2860_v28 = vpop.f32.mrb[124].mxu1  ;;  %v2866_v47 = vadd.f32 %v2846_v48, %v2777_v25  ;;  %v5014_v25 = vld [vmem:[%s6232_s8] ss:$16 sps:$4 sm:$0x1f]  }
 0x588   :  { %v4906_v30 = vpop.f32.mrb[125].mxu1  ;;  %v3121_v27 = vsel %vm823_vm2, %v5014_v25, 0 }
 0x589   :  { %v2863_v31 = vpop.f32.mrb[126].mxu1  ;;  %v2867_v46 = vadd.f32 %v2849_v49, %v2778_v57  ;;  %v5009_v49 = vld [vmem:[%s6232_s8 + $0x6c] ss:$16 sps:$4 sm:$0x1f]  }
 0x58a   :  { %v4907_v34 = vpop.f32.mrb[127].mxu1  ;;  %v5019_v57 = vld [vmem:[%s6232_s8 + $0x88] ss:$16 sps:$4 sm:$0x1f]  }
 0x58b   :  { %v3495_v30 = vsel %vm823_vm2, %v5019_v57, 0  ;;  %v5021_v31 = vld [vmem:[%s6232_s8 + $0xac] ss:$16 sps:$4 sm:$0x1f]  }
 0x58c   :  { %v2765_v23 = vpop.f32.mrb[140].mxu0  ;;  %v5025_v34 = vld [vmem:[%s6232_s8 + $0xa8] ss:$16 sps:$4 sm:$0x1f]  }
 0x58d   :  { %v4888_v20 = vpop.f32.mrb[141].mxu0 }
 0x58e   :  { %v2767_v37 = vpop.f32.mrb[142].mxu0  ;;  %v5023_v20 = vld [vmem:[%s6232_s8 + $0x64] ss:$16 sps:$4 sm:$0x1f]  }
 0x58f   :  { %v4889_v41 = vpop.f32.mrb[143].mxu0 }
 0x590   :  { %v3620_v41 = vsel %vm823_vm2, %v5025_v34, 0 }
 0x594   :  { %v2771_v61 = vpop.f32.mrb[144].mxu0 }
 0x595   :  { %v2779_v4 = vadd.f32 %v2771_v61, %v2697_v5  ;;  %v4892_v6 = vpop.f32.mrb[145].mxu0  ;;  %v3015_v5 = vsel %vm823_vm2, %v5008_v1, 0  ;;  %v5026_v61 = vld [vmem:[%s6232_s8 + $0x60] ss:$16 sps:$4 sm:$0x1f]   ;;  %v5059_v1 = vld [vmem:[%s6234_s10 + $0x78] sm:$0xff]  }
 0x596   :  { %v2774_v22 = vpop.f32.mrb[146].mxu0 }
 0x597   :  { %v4893_v33 = vpop.f32.mrb[147].mxu0  ;;  %v2868_v38 = vadd.f32 %v2860_v28, %v2779_v4  ;;  %v5017_v28 = vld [vmem:[%s6232_s8 + $0x44] ss:$16 sps:$4 sm:$0x1f]   ;;  %v3366_v22 = vsel %vm823_vm2, %v5026_v61, 0 }
 0x598   :  { %v5027_v33 = vld [vmem:[%s6232_s8 + $0x84] ss:$16 sps:$4 sm:$0x1f]  }
 0x59c   :  { %v2929_v40 = vpop.f32.mrb[148].mxu0 }
 0x59d   :  { %v2949_v10 = vadd.f32 %v2929_v40, %v2866_v47  ;;  %v4912_v17 = vpop.f32.mrb[149].mxu0  ;;  %v5029_v40 = vld [vmem:[%s6232_s8 + $0x80] ss:$16 sps:$4 sm:$0x1f]  }
 0x59e   :  { %v2932_v63 = vpop.f32.mrb[150].mxu0  ;;  %v5032_v17 = vld [vmem:[%s6232_s8 + $0xa0] ss:$16 sps:$4 sm:$0x1f]  }
 0x59f   :  { %v2959_v26 = vadd.f32 %v4288_v42, %v2949_v10  ;;  %v2950_v60 = vadd.f32 %v2932_v63, %v2867_v46  ;;  %v4913_v59 = vpop.f32.mrb[151].mxu0  ;;  %v5020_v46 = vld [vmem:[%s6232_s8 + $0x40] ss:$16 sps:$4 sm:$0x1f]   ;;  %v3614_v63 = vsel %vm823_vm2, %v5032_v17, 0 }
 0x5a0   :  { %v3241_v23 = vsel %vm823_vm2, %v5020_v46, 0  ;;  %v5030_v10 = vld [vmem:[%s6232_s8 + $0xa4] ss:$16 sps:$4 sm:$0x1f]  }
 0x5a1   :  { %v2960_v62 = vadd.f32 %v4288_v42, %v2950_v60  ;;  %v2962_v44 = vmax.f32 %v2959_v26, 0.0  ;;  %v5033_v26 = vld [vmem:[%s6234_s10 + $0x80] sm:$0xff]   ;;  %v5034_v60 = vld [vmem:[%s6234_s10 + $0x88] sm:$0xff]   ;;  %v5035_v59 = vld [vmem:[%s6234_s10 + $0x90] sm:$0xff]  }
 0x5a3   :  { %v2963_v56 = vmax.f32 %v2960_v62, 0.0  ;;  %v5036_v62 = vld [vmem:[%s6234_s10 + $0x98] sm:$0xff]  }
 0x5a4   :  { %v2937_v50 = vpop.f32.mrb[152].mxu0 }
 0x5a5   :  { %v2965_v3 = vpack.c.bf16 %v2963_v56, %v2962_v44  ;;  %v4916_v24 = vpop.f32.mrb[153].mxu0  ;;  %v5037_v44 = vld [vmem:[%s6234_s10 + $0xa0] sm:$0xff]   ;;  %v5038_v56 = vld [vmem:[%s6234_s10 + $0xa8] sm:$0xff]   ;;  %v5039_v50 = vld [vmem:[%s6234_s10 + $0xb0] sm:$0xff]  }
 0x5a6   :  { %v2939_v45 = vpop.f32.mrb[154].mxu0  ;;  %v5041_v24 = vld [vmem:[%s6234_s10 + $0xc0] sm:$0xff]  }
 0x5a7   :  { %v4917_v29 = vpop.f32.mrb[155].mxu0  ;;  %v5043_v45 = vld [vmem:[%s6234_s10 + $0x40] sm:$0xff]  }
 0x5a8   :  { %v5044_v29 = vld [vmem:[%s6234_s10] sm:$0xff]  }
 0x5ac   :  { %v2943_v9 = vpop.f32.mrb[156].mxu0 }
 0x5ad   :  { %v2951_v43 = vadd.f32 %v2943_v9, %v2868_v38  ;;  %v4920_v54 = vpop.f32.mrb[157].mxu0  ;;  %v5046_v9 = vld [vmem:[%s6234_s10 + $0x48] sm:$0xff]  }
 0x5ae   :  { %v2946_v55 = vpop.f32.mrb[158].mxu0  ;;  %v5047_v54 = vld [vmem:[%s6234_s10 + $0x8] sm:$0xff]  }
 0x5af   :  { %v2961_v52 = vadd.f32 %v4288_v42, %v2951_v43  ;;  %v4921_v51 = vpop.f32.mrb[159].mxu0  ;;  %v3489_v42 = vsel %vm823_vm2, %v5029_v40, 0  ;;  %v5042_v43 = vld [vmem:[%s6234_s10 + $0xc8] sm:$0xff]   ;;  %v5049_v55 = vld [vmem:[%s6234_s10 + $0x50] sm:$0xff]   ;;  %v3714_v40 = vshrl.u32 %v50_v16, 7 }
 0x5b0   :  { %v5048_v51 = vld [vmem:[%s6234_s10 + $0xd8] ss:$0 sps:$4 sm:$0x33]  }
 0x5b1   :  { %v2964_v21 = vmax.f32 %v2961_v52, 0.0  ;;  %v5045_v52 = vld [vmem:[%s6234_s10 + $0xd0] sm:$0xff]  }
 0x5b3   :  { %v2966_v13 = vpack.c.bf16 %v2964_v21, %v2964_v21  ;;  %v5050_v21 = vld [vmem:[%s6234_s10 + $0x10] sm:$0xff]  }
 0x5b5   :  { %v2968_v48 = vrot.slane %v2966_v13, 5  ;;  %v4007_v13 = vand.u32 %v5048_v51, %v5158_v12  ;;  %v5056_v12 = vld [vmem:[%s6234_s10 + $0x28] sm:$0xff]  }
 0x5b7   :  { %v6010_v36 = vsel %vm2872_vm8, %v2965_v3, %v2968_v48  ;;  %v5040_v3 = vld [vmem:[%s6234_s10 + $0xb8] sm:$0xff]  }
 0x5b8   :  { %v2984_v58 = vshll.u32 %v6010_v36, 16  ;;  %4308 = vmatmul.mubr.msk.bf16.vlgmr.msra.gmra.mrb[160].mxu0 %vm3004_vm9, %v6010_v36  ;;  %v2982_v2 = vshrl.u32 %v6010_v36, 16  ;;  %v3220_v11 = vrot.slane %v6010_v36, 1  ;;  %v3468_v37 = vrot.slane %v6010_v36, 2  ;;  %v5052_v48 = vld [vmem:[%s6234_s10 + $0x18] sm:$0xff]  }
 0x5b9   :  { %3294 = vmatpush1.bf16.msra.mxu0 %v3247_v53  ;;  %3325 = vmatprep.mubr.bf16.mxu0 %v5061_v0  ;;  %v5053_v53 = vld [vmem:[%s6234_s10 + $0x60] sm:$0xff]  }
 0x5ba   :  { %v2986_v32 = vrot.slane %v2984_v58, 1  ;;  %4331 = vmatprep.subr.msk.bf16.mxu0 %vm823_vm2, %v5009_v49  ;;  %v3343_v15 = vrot.slane %v2982_v2, 1  ;;  %v3344_v18 = vrot.slane %v2984_v58, 2  ;;  %v3591_v4 = vrot.slane %v2982_v2, 2  ;;  %v5054_v49 = vld [vmem:[%s6234_s10 + $0x20] sm:$0xff]  }
 0x5bb   :  { %v3592_v6 = vrot.slane %v2984_v58, 3  ;;  %v5058_v58 = vld [vmem:[%s6234_s10 + $0x30] sm:$0xff]  }
 0x5bc   :  { %v2987_v39 = vor.u32 %v2986_v32, %v2982_v2  ;;  %v3345_v47 = vor.u32 %v3344_v18, %v3343_v15  ;;  %v5060_v2 = vld [vmem:[%s6234_s10 + $0x38] sm:$0xff]  }
 0x5bd   :  { %v3593_v38 = vor.u32 %v3592_v6, %v3591_v4 }
 0x5be   :  { %4298 = vmatmul.mubr.msk.bf16.vlgmr.msra.gmra.mrb[128].mxu1 %vm3004_vm9, %v2987_v39 }
 0x5bf   :  { %3062 = vmatpush1.bf16.msra.mxu1 %v3015_v5  ;;  %3093 = vmatprep.mubr.bf16.mxu1 %v5061_v0 }
 0x5c0   :  { %4320 = vmatmul.mubr.msk.bf16.vlgmr.msra.gmra.mrb[164].mxu0 %vm3004_vm9, %v3220_v11  ;;  %4305 = vmatprep.subr.msk.bf16.mxu1 %vm823_vm2, %v5011_v7 }
 0x5c1   :  { %3419 = vmatpush1.bf16.msra.mxu0 %v3372_v14  ;;  %3450 = vmatprep.mubr.bf16.mxu0 %v5061_v0 }
 0x5c2   :  { %4343 = vmatprep.subr.msk.bf16.mxu0 %vm823_vm2, %v5015_v19 }
 0x5c6   :  { %4300 = vmatmul.mubr.msk.bf16.vlgmr.msra.gmra.mrb[132].mxu1 %vm3004_vm9, %v2987_v39 }
 0x5c7   :  { %3133 = vmatpush1.bf16.msra.mxu1 %v3121_v27  ;;  %3164 = vmatprep.mubr.bf16.mxu1 %v5061_v0 }
 0x5c8   :  { %4332 = vmatmul.mubr.msk.bf16.vlgmr.msra.gmra.mrb[168].mxu0 %vm3004_vm9, %v3345_v47  ;;  %4317 = vmatprep.subr.msk.bf16.mxu1 %vm823_vm2, %v5017_v28 }
 0x5c9   :  { %3542 = vmatpush1.bf16.msra.mxu0 %v3495_v30  ;;  %3573 = vmatprep.mubr.bf16.mxu0 %v5061_v0 }
 0x5ca   :  { %4355 = vmatprep.subr.msk.bf16.mxu0 %vm823_vm2, %v5021_v31 }
 0x5ce   :  { %4306 = vmatmul.mubr.msk.bf16.vlgmr.msra.gmra.mrb[136].mxu1 %vm3004_vm9, %v6010_v36  ;;  %v5057_v36 = vld [vmem:[%s6234_s10 + $0x70] sm:$0xff]  }
 0x5cf   :  { %3253 = vmatpush1.bf16.msra.mxu1 %v3241_v23  ;;  %3284 = vmatprep.mubr.bf16.mxu1 %v5061_v0 }
 0x5d0   :  { %4344 = vmatmul.mubr.msk.bf16.vlgmr.msra.gmra.mrb[172].mxu0 %vm3004_vm9, %v3468_v37  ;;  %4329 = vmatprep.subr.msk.bf16.mxu1 %vm823_vm2, %v5023_v20 }
 0x5d1   :  { %3667 = vmatpush1.bf16.msra.mxu0 %v3620_v41  ;;  %3698 = vmatprep.mubr.bf16.mxu0 %v5061_v0 }
 0x5d2   :  { %4049 = vmatprep.subr.bf16.mxu0 %v5061_v0 }
 0x5d6   :  { %4318 = vmatmul.mubr.msk.bf16.vlgmr.msra.gmra.mrb[140].mxu1 %vm3004_vm9, %v3220_v11 }
 0x5d7   :  { %3378 = vmatpush1.bf16.msra.mxu1 %v3366_v22  ;;  %3409 = vmatprep.mubr.bf16.mxu1 %v5061_v0 }
 0x5d8   :  { %4356 = vmatmul.mubr.msk.bf16.vlgmr.msra.gmra.mrb[176].mxu0 %vm3004_vm9, %v3593_v38  ;;  %4341 = vmatprep.subr.msk.bf16.mxu1 %vm823_vm2, %v5027_v33 }
 0x5d9   :  { %4050 = vmatpush1.bf16.msra.mxu0 %v5033_v26 }
 0x5da   :  { %4051 = vmatprep.subr.bf16.mxu0 %v5061_v0 }
 0x5dd   :  { %4052 = vmatpush1.bf16.msra.mxu0 %v5034_v60 }
 0x5de   :  { %4330 = vmatmul.mubr.msk.bf16.vlgmr.msra.gmra.mrb[144].mxu1 %vm3004_vm9, %v3345_v47  ;;  %4053 = vmatprep.subr.bf16.mxu0 %v5061_v0 }
 0x5df   :  { %3501 = vmatpush1.bf16.msra.mxu1 %v3489_v42  ;;  %3532 = vmatprep.mubr.bf16.mxu1 %v5061_v0 }
 0x5e0   :  { %4353 = vmatprep.subr.msk.bf16.mxu1 %vm823_vm2, %v5030_v10 }
 0x5e1   :  { %4054 = vmatpush1.bf16.msra.mxu0 %v5035_v59 }
 0x5e2   :  { %4055 = vmatprep.subr.bf16.mxu0 %v5061_v0 }
 0x5e5   :  { %4056 = vmatpush1.bf16.msra.mxu0 %v5036_v62 }
 0x5e6   :  { %4342 = vmatmul.mubr.msk.bf16.vlgmr.msra.gmra.mrb[148].mxu1 %vm3004_vm9, %v3468_v37  ;;  %4057 = vmatprep.subr.bf16.mxu0 %v5061_v0 }
 0x5e7   :  { %3626 = vmatpush1.bf16.msra.mxu1 %v3614_v63  ;;  %3657 = vmatprep.mubr.bf16.mxu1 %v5061_v0 }
 0x5e8   :  { %4518 = vmatprep.subr.bf16.mxu1 %v5043_v45 }
 0x5e9   :  { %4058 = vmatpush1.bf16.msra.mxu0 %v5037_v44 }
 0x5ea   :  { %4059 = vmatprep.subr.bf16.mxu0 %v5061_v0 }
 0x5ed   :  { %4060 = vmatpush1.bf16.msra.mxu0 %v5038_v56  ;;  %v3723_v56 = vsub.s32 2, %v3714_v40 }
 0x5ee   :  { %4354 = vmatmul.mubr.msk.bf16.vlgmr.msra.gmra.mrb[152].mxu1 %vm3004_vm9, %v3593_v38  ;;  %4061 = vmatprep.subr.bf16.mxu0 %v5061_v0 }
 0x5ef   :  { %4519 = vmatpush3.bf16.msra.mxu1 %v5044_v29 }
 0x5f0   :  { %4520 = vmatprep.subr.bf16.mxu1 %v5046_v9 }
 0x5f1   :  { %4062 = vmatpush1.bf16.msra.mxu0 %v5039_v50  ;;  %v3711_v50 = vld [vmem:[%s6235_s9] sm:$0xf] }
 0x5f2   :  { %4063 = vmatprep.subr.bf16.mxu0 %v5061_v0  ;;  %v3724_v9 = vrot.slane %v3711_v50, %v3723_v56 }
 0x5f3   :  { %4521 = vmatpush3.bf16.msra.mxu1 %v5047_v54 }
 0x5f4   :  { %4522 = vmatprep.subr.bf16.mxu1 %v5049_v55 }
 0x5f5   :  { %4064 = vmatpush1.bf16.msra.mxu0 %v5040_v3  ;;  %v3727_v3 = vsub.s32 3, %v3714_v40 }
 0x5f6   :  { %4065 = vmatprep.subr.bf16.mxu0 %v5061_v0 }
 0x5f7   :  { %4523 = vmatpush3.bf16.msra.mxu1 %v5050_v21  ;;  %v3728_v55 = vrot.slane %v3711_v50, %v3727_v3 }
 0x5f8   :  { %4524 = vmatprep.subr.bf16.mxu1 %v5051_v35 }
 0x5f9   :  { %4066 = vmatpush1.bf16.msra.mxu0 %v5041_v24 }
 0x5fa   :  { %4067 = vmatprep.subr.bf16.mxu0 %v5061_v0 }
 0x5fb   :  { %4525 = vmatpush3.bf16.msra.mxu1 %v5052_v48 }
 0x5fc   :  { %4526 = vmatprep.subr.bf16.mxu1 %v5053_v53 }
 0x5fd   :  { %4068 = vmatpush1.bf16.msra.mxu0 %v5042_v43 }
 0x5fe   :  { %4069 = vmatprep.subr.bf16.mxu0 %v5061_v0 }
 0x5ff   :  { %4527 = vmatpush3.bf16.msra.mxu1 %v5054_v49 }
 0x601   :  { %4070 = vmatpush1.bf16.msra.mxu0 %v5045_v52 }
 0x602   :  { %4071 = vmatprep.subr.bf16.mxu0 %v5061_v0  ;;  %v5055_v0 = vld [vmem:[%s6234_s10 + $0x68] sm:$0xff]  }
 0x603   :  { %4528 = vmatprep.subr.bf16.mxu1 %v5055_v0 }
 0x604   :  { %4529 = vmatpush3.bf16.msra.mxu1 %v5056_v12 }
 0x605   :  { %4072 = vmatpush1.bf16.msra.mxu0 %v4007_v13  ;;  %4530 = vmatprep.subr.bf16.mxu1 %v5057_v36 }
 0x608   :  { %4531 = vmatpush3.bf16.msra.mxu1 %v5058_v58 }
 0x609   :  { %4532 = vmatprep.subr.bf16.mxu1 %v5059_v1 }
 0x60c   :  { %4533 = vmatpush3.bf16.msra.mxu1 %v5060_v2 }
 0x68b   :  { %v3207_v32 = vpop.f32.mrb[160].mxu0 }
 0x68c   :  { %v3209_v8 = vpop.f32.mrb[161].mxu0 }
 0x68d   :  { %v3211_v39 = vpop.f32.mrb[162].mxu0 }
 0x68e   :  { %v3212_v5 = vpop.f32.mrb[163].mxu0 }
 0x691   :  { %v3054_v7 = vpop.f32.mrb[128].mxu1 }
 0x692   :  { %v3056_v11 = vpop.f32.mrb[129].mxu1 }
 0x693   :  { %v3058_v14 = vpop.f32.mrb[130].mxu1  ;;  %v3327_v19 = vpop.f32.mrb[164].mxu0 }
 0x694   :  { %v3059_v25 = vpop.f32.mrb[131].mxu1  ;;  %v3329_v15 = vpop.f32.mrb[165].mxu0 }
 0x695   :  { %v3331_v18 = vpop.f32.mrb[166].mxu0 }
 0x696   :  { %v3332_v57 = vpop.f32.mrb[167].mxu0 }
 0x699   :  { %v3095_v27 = vpop.f32.mrb[132].mxu1 }
 0x69a   :  { %v3208_v28 = vadd.f32 %v3207_v32, %v3095_v27  ;;  %v3097_v47 = vpop.f32.mrb[133].mxu1 }
 0x69b   :  { %v3210_v30 = vadd.f32 %v3209_v8, %v3097_v47  ;;  %v3099_v31 = vpop.f32.mrb[134].mxu1  ;;  %v3452_v46 = vpop.f32.mrb[168].mxu0 }
 0x69c   :  { %v3336_v34 = vadd.f32 %v3327_v19, %v3208_v28  ;;  %v3100_v23 = vpop.f32.mrb[135].mxu1  ;;  %v3454_v20 = vpop.f32.mrb[169].mxu0 }
 0x69d   :  { %v3337_v37 = vadd.f32 %v3329_v15, %v3210_v30  ;;  %v3456_v41 = vpop.f32.mrb[170].mxu0 }
 0x69e   :  { %v3461_v61 = vadd.f32 %v3452_v46, %v3336_v34  ;;  %v3457_v4 = vpop.f32.mrb[171].mxu0  ;;  %v3715_v46 = vsub.s32 0, %v3714_v40  ;;  %v3719_v34 = vsub.s32 1, %v3714_v40 }
 0x69f   :  { %v3462_v6 = vadd.f32 %v3454_v20, %v3337_v37 }
 0x6a0   :  { %v3716_v23 = vrot.slane %v3711_v50, %v3715_v46  ;;  %v3720_v37 = vrot.slane %v3711_v50, %v3719_v34 }
 0x6a1   :  { %v3166_v22 = vpop.f32.mrb[136].mxu1 }
 0x6a2   :  { %v3167_v33 = vadd.f32 %v3166_v22, %v3054_v7  ;;  %v3168_v38 = vpop.f32.mrb[137].mxu1 }
 0x6a3   :  { %v3169_v42 = vadd.f32 %v3168_v38, %v3056_v11  ;;  %v3170_v10 = vpop.f32.mrb[138].mxu1  ;;  %v3575_v17 = vpop.f32.mrb[172].mxu0 }
 0x6a4   :  { %v3584_v63 = vadd.f32 %v3575_v17, %v3461_v61  ;;  %v3171_v26 = vpop.f32.mrb[139].mxu1  ;;  %v3577_v60 = vpop.f32.mrb[173].mxu0 }
 0x6a5   :  { %v3585_v59 = vadd.f32 %v3577_v60, %v3462_v6  ;;  %v3579_v62 = vpop.f32.mrb[174].mxu0 }
 0x6a6   :  { %v3580_v44 = vpop.f32.mrb[175].mxu0 }
 0x6a9   :  { %v3286_v24 = vpop.f32.mrb[140].mxu1 }
 0x6aa   :  { %v3334_v45 = vadd.f32 %v3286_v24, %v3167_v33  ;;  %v3288_v29 = vpop.f32.mrb[141].mxu1 }
 0x6ab   :  { %v3335_v16 = vadd.f32 %v3288_v29, %v3169_v42  ;;  %v3290_v43 = vpop.f32.mrb[142].mxu1  ;;  %v3700_v54 = vpop.f32.mrb[176].mxu0  ;;  %v4357_v29 = vld [vmem:[%s6236_s11] ss:$0 sm:$0xff] }
 0x6ac   :  { %v3709_v52 = vadd.f32 %v3700_v54, %v3584_v63  ;;  %v3291_v51 = vpop.f32.mrb[143].mxu1  ;;  %v3702_v21 = vpop.f32.mrb[177].mxu0 }
 0x6ad   :  { %v3710_v35 = vadd.f32 %v3702_v21, %v3585_v59  ;;  %v3704_v13 = vpop.f32.mrb[178].mxu0 }
 0x6ae   :  { %v3735_v48 = vadd.f32 %v3724_v9, %v3709_v52  ;;  %v3705_v53 = vpop.f32.mrb[179].mxu0 }
 0x6af   :  { %v3736_v49 = vadd.f32 %v3728_v55, %v3710_v35 }
 0x6b0   :  { %v3739_v0 = vmax.f32 %v3735_v48, 0.0 }
 0x6b1   :  { %v3740_v12 = vmax.f32 %v3736_v49, 0.0  ;;  %v3411_v36 = vpop.f32.mrb[144].mxu1 }
 0x6b2   :  { %v3743_v58 = vpack.c.bf16 %v3739_v0, %v3739_v0  ;;  %v3459_v1 = vadd.f32 %v3411_v36, %v3334_v45  ;;  %v3413_v2 = vpop.f32.mrb[145].mxu1 }
 0x6b3   :  { %v3744_v32 = vpack.c.bf16 %v3740_v12, %v3740_v12  ;;  %v3460_v8 = vadd.f32 %v3413_v2, %v3335_v16  ;;  %v3415_v39 = vpop.f32.mrb[146].mxu1 }
 0x6b4   :  { %v3754_v5 = vshll.u32 %v3743_v58, 16  ;;  %v3416_v7 = vpop.f32.mrb[147].mxu1 }
 0x6b5   :  { %v3758_v11 = vshll.u32 %v3744_v32, 16 }
 0x6b6   :  { %v3756_v14 = vrot.slane %v3754_v5, 3 }
 0x6b7   :  { %v3760_v25 = vrot.slane %v3758_v11, 3 }
 0x6b8   :  { %v3770_v28 = vsel %vm6207_vm11, %v3743_v58, %v3756_v14 }
 0x6b9   :  { %v3534_v15 = vpop.f32.mrb[148].mxu1  ;;  %v3771_v18 = vsel %vm6207_vm11, %v3744_v32, %v3760_v25 }
 0x6ba   :  { %v3582_v57 = vadd.f32 %v3534_v15, %v3459_v1  ;;  %v3536_v27 = vpop.f32.mrb[149].mxu1  ;;  %4386 = vmatprep.mubr.msk.bf16.mxu0 %vm3999_vm12, %v3771_v18 }
 0x6bb   :  { %v3583_v47 = vadd.f32 %v3536_v27, %v3460_v8  ;;  %v3538_v30 = vpop.f32.mrb[150].mxu1  ;;  %4082 = vmatmul.mubr.bf16.vlgmr.msra.gmra.mrb[180].mxu0 %v3770_v28 }
 0x6bc   :  { %v3539_v31 = vpop.f32.mrb[151].mxu1 }
 0x6c1   :  { %v3659_v20 = vpop.f32.mrb[152].mxu1 }
 0x6c2   :  { %v3707_v41 = vadd.f32 %v3659_v20, %v3582_v57  ;;  %v3661_v61 = vpop.f32.mrb[153].mxu1 }
 0x6c3   :  { %v3708_v4 = vadd.f32 %v3661_v61, %v3583_v47  ;;  %v3663_v6 = vpop.f32.mrb[154].mxu1 }
 0x6c4   :  { %v3733_v22 = vadd.f32 %v3716_v23, %v3707_v41  ;;  %v3664_v33 = vpop.f32.mrb[155].mxu1 }
 0x6c5   :  { %v3734_v38 = vadd.f32 %v3720_v37, %v3708_v4 }
 0x6c6   :  { %v3737_v42 = vmax.f32 %v3733_v22, 0.0 }
 0x6c7   :  { %v3738_v10 = vmax.f32 %v3734_v38, 0.0 }
 0x6c8   :  { %v3741_v17 = vpack.c.bf16 %v3737_v42, %v3737_v42 }
 0x6c9   :  { %v3742_v63 = vpack.c.bf16 %v3738_v10, %v3738_v10 }
 0x6ca   :  { %v3746_v26 = vshll.u32 %v3741_v17, 16 }
 0x6cb   :  { %v3750_v60 = vshll.u32 %v3742_v63, 16 }
 0x6cc   :  { %v3748_v59 = vrot.slane %v3746_v26, 3 }
 0x6cd   :  { %v3752_v62 = vrot.slane %v3750_v60, 3 }
 0x6ce   :  { %v3768_v44 = vsel %vm6207_vm11, %v3741_v17, %v3748_v59 }
 0x6cf   :  { %v3769_v40 = vsel %vm6207_vm11, %v3742_v63, %v3752_v62 }
 0x6d0   :  { %4041 = vmatprep.mubr.bf16.mxu1 %v3769_v40 }
 0x6d1   :  { %4042 = vmatmul.mubr.bf16.vlgmr.msra.gmra.mrb[156].mxu1 %v3768_v44 }
 0x78e   :  { %v4083_v56 = vpop.f32.mrb[180].mxu0 }
 0x78f   :  { %v4085_v50 = vpop.f32.mrb[181].mxu0 }
 0x790   :  { %v4086_v3 = vpop.f32.mrb[182].mxu0 }
 0x791   :  { %v4087_v24 = vpop.f32.mrb[183].mxu0 }
 0x7a4   :  { %v4534_v45 = vpop.f32.mrb[156].mxu1 }
 0x7a5   :  { %v4535_v9 = vpop.f32.mrb[157].mxu1 }
 0x7a6   :  { %v4536_v16 = vadd.f32 %v4535_v9, %v4534_v45  ;;  %v4537_v43 = vpop.f32.mrb[158].mxu1 }
 0x7a7   :  { %v4538_v54 = vpop.f32.mrb[159].mxu1 }
 0x7a8   :  { %v4044_v55 = vadd.f32 %v4536_v16, %v4357_v29 }
 0x7aa   :  { %v4084_v52 = vadd.f32 %v4083_v56, %v4044_v55 }
 0x7ac   :  { %4090 = vst.msk [vmem:[%s6237_s12] sm:$0x3] %vm4089_vm1, %v4084_v52 }

</bundles_post_ra>
